<compile_context>
chip_gen: v7x
topology: tpu7x:2x2x1
jax: 0.10.0
libtpu: 0.0.40
codegen_flags: <defaults>
</compile_context>

<pallas_src>
import math
import functools

import jax
import jax.numpy as jnp
from jax.experimental import pallas as pl
from jax.experimental.pallas import tpu as pltpu


# ----------------------------- kernel -------------------------------------- #

def _layernorm(x, gamma, beta, eps=1e-5):
    mu = jnp.mean(x, axis=-1, keepdims=True)
    var = jnp.mean((x - mu) ** 2, axis=-1, keepdims=True)
    return (x - mu) * jax.lax.rsqrt(var + eps) * gamma + beta


def tf_encoder_kernel(x_ref, pe_ref, emb_w_ref, emb_b_ref,
                      wqkv_ref, bqkv_ref, wo_ref, bo_ref,
                      g1_ref, be1_ref, w1_ref, b1_ref, w2_ref, b2_ref,
                      g2_ref, be2_ref,
                      o_ref, *, B, W, D, nhead, num_layers, scale):
    BW = B * W
    hd = D // nhead
    inv_sqrt_hd = 1.0 / math.sqrt(hd)

    # Embedding Linear(1, D) * sqrt(d_model) + positional encoding, whole batch.
    x = x_ref[...]                                                   # (B*W, 1)
    h = (x * emb_w_ref[...] + emb_b_ref[...]) * scale + pe_ref[...]  # (B*W, D)

    for l in range(num_layers):                    # static unroll over layers
        wqkv = wqkv_ref[l]                         # (D, 3D)  pre-transposed
        bqkv = bqkv_ref[l]                         # (1, 3D)
        wo = wo_ref[l]                             # (D, D)
        bo = bo_ref[l]                             # (1, D)
        w1 = w1_ref[l]                             # (D, F)
        b1 = b1_ref[l]                             # (1, F)
        w2 = w2_ref[l]                             # (F, D)
        b2 = b2_ref[l]                             # (1, D)

        # ---- self-attention: fused QKV projection (single MXU matmul) ----
        qkv = jnp.dot(h, wqkv, preferred_element_type=jnp.float32) + bqkv  # (BW, 3D)

        attn = jnp.zeros((BW, D), jnp.float32)
        for hh in range(nhead):                    # static unroll over heads
            lo = hh * hd
            qh = qkv[:, lo:lo + hd].reshape(B, W, hd)
            kh = qkv[:, D + lo:D + lo + hd].reshape(B, W, hd)
            vh = qkv[:, 2 * D + lo:2 * D + lo + hd].reshape(B, W, hd)

            s = jnp.einsum('bqd,bkd->bqk', qh, kh,
                           preferred_element_type=jnp.float32) * inv_sqrt_hd
            s = s - jnp.max(s, axis=-1, keepdims=True)
            p = jnp.exp(s)
            p = p * pl.reciprocal(jnp.sum(p, axis=-1, keepdims=True), approx=True)
            oh = jnp.einsum('bqk,bkd->bqd', p, vh,
                            preferred_element_type=jnp.float32)      # (B, W, hd)

            # Fold the output projection per head (avoids head concatenate).
            attn = attn + jnp.dot(oh.reshape(BW, hd), wo[lo:lo + hd, :],
                                  preferred_element_type=jnp.float32)
        attn = attn + bo

        # TODO(synk): dropout omitted (eval-mode identity).
        h = _layernorm(h + attn, g1_ref[l], be1_ref[l])

        # ---- feed forward (relu, PyTorch default activation) ----
        ff = jnp.dot(h, w1, preferred_element_type=jnp.float32) + b1
        ff = jnp.maximum(ff, 0.0)
        ff = jnp.dot(ff, w2, preferred_element_type=jnp.float32) + b2
        h = _layernorm(h + ff, g2_ref[l], be2_ref[l])

    o_ref[...] = h.astype(o_ref.dtype)


# ----------------------------- wrapper -------------------------------------- #

def _full_spec(arr):
    nd = arr.ndim
    return pl.BlockSpec(arr.shape, lambda i, _nd=nd: (0,) * _nd)


def tf_encoder_forward(x, params, *, d_model, nhead):
    B, W, _ = x.shape
    num_layers = params["wqkv"].shape[0]

    # Wrapper-side layout plumbing (free): flatten batch*seq, pre-tile the PE.
    x_flat = x.reshape(B * W, 1).astype(jnp.float32)
    pe_tiled = jnp.tile(params["pe"][:W], (B, 1))       # (B*W, D)

    args = [x_flat, pe_tiled, params["emb_w"], params["emb_b"],
            params["wqkv"], params["bqkv"], params["wo"], params["bo"],
            params["g1"], params["be1"], params["w1"], params["b1"],
            params["w2"], params["b2"], params["g2"], params["be2"]]

    out = pl.pallas_call(
        functools.partial(tf_encoder_kernel, B=B, W=W, D=d_model,
                          nhead=nhead, num_layers=num_layers,
                          scale=math.sqrt(d_model)),
        out_shape=jax.ShapeDtypeStruct((B * W, d_model), jnp.float32),
        grid=(1,),
        in_specs=[_full_spec(a) for a in args],
        out_specs=pl.BlockSpec((B * W, d_model), lambda i: (0, 0)),
        compiler_params=pltpu.CompilerParams(dimension_semantics=("arbitrary",)),
    )(*args)
    return out.reshape(B, W, d_model)


# ----------------------------- param init ----------------------------------- #

def make_positional_encoding(d_model, max_len=100):
    position = jnp.arange(max_len, dtype=jnp.float32)[:, None]
    div_term = jnp.exp(jnp.arange(0, d_model, 2, dtype=jnp.float32)
                       * (-math.log(10000.0) / d_model))
    pe = jnp.zeros((max_len, d_model), jnp.float32)
    pe = pe.at[:, 0::2].set(jnp.sin(position * div_term))
    pe = pe.at[:, 1::2].set(jnp.cos(position * div_term))
    return pe


def init_params(key, *, d_model, nhead, num_layers, dim_feedforward):
    D, F, L = d_model, dim_feedforward, num_layers

    def nrm(k, shape, scale=0.05):
        return (scale * jax.random.normal(k, shape)).astype(jnp.float32)

    keys = jax.random.split(key, 2 + 8 * L)
    params = {
        "emb_w": nrm(keys[0], (1, D)),      # Linear(1, D) weight, stored (in, out)
        "emb_b": nrm(keys[1], (1, D)),
        "pe": make_positional_encoding(D),
    }

    kit = iter(keys[2:])
    wqkv, bqkv, wo, bo, w1, b1, w2, b2 = ([] for _ in range(8))
    for _ in range(L):
        wqkv.append(nrm(next(kit), (D, 3 * D)))   # fused Q/K/V, pre-transposed
        bqkv.append(nrm(next(kit), (1, 3 * D)))
        wo.append(nrm(next(kit), (D, D)))         # out_proj, pre-transposed
        bo.append(nrm(next(kit), (1, D)))
        w1.append(nrm(next(kit), (D, F)))         # FFN, pre-transposed
        b1.append(nrm(next(kit), (1, F)))
        w2.append(nrm(next(kit), (F, D)))
        b2.append(nrm(next(kit), (1, D)))

    params.update({
        "wqkv": jnp.stack(wqkv), "bqkv": jnp.stack(bqkv),
        "wo": jnp.stack(wo), "bo": jnp.stack(bo),
        "w1": jnp.stack(w1), "b1": jnp.stack(b1),
        "w2": jnp.stack(w2), "b2": jnp.stack(b2),
        "g1": jnp.ones((L, 1, D), jnp.float32), "be1": jnp.zeros((L, 1, D), jnp.float32),
        "g2": jnp.ones((L, 1, D), jnp.float32), "be2": jnp.zeros((L, 1, D), jnp.float32),
    })
    return params


# ----------------------------- main ------------------------------------------ #

if __name__ == "__main__":
    B, W = 2, 8
    d_model, nhead, num_layers, dim_feedforward = 32, 4, 2, 64

    key = jax.random.PRNGKey(0)
    kx, kp = jax.random.split(key)
    x = jax.random.normal(kx, (B, W, 1), dtype=jnp.float32)

    params = init_params(kp, d_model=d_model, nhead=nhead,
                         num_layers=num_layers, dim_feedforward=dim_feedforward)

    out = tf_encoder_forward(x, params, d_model=d_model, nhead=nhead)
    out = jax.block_until_ready(out)
    assert out.shape == (B, W, d_model)
    print("KERNEL_OK")
</pallas_src>

<mosaic_0001>
module attributes {stable_mosaic.version = 11 : i64} {
  func.func @tf_encoder_kernel(%arg0: i32, %arg1: memref<16x1xf32, #tpu.memory_space<vmem>>, %arg2: memref<16x32xf32, #tpu.memory_space<vmem>>, %arg3: memref<1x32xf32, #tpu.memory_space<vmem>>, %arg4: memref<1x32xf32, #tpu.memory_space<vmem>>, %arg5: memref<2x32x96xf32, #tpu.memory_space<vmem>>, %arg6: memref<2x1x96xf32, #tpu.memory_space<vmem>>, %arg7: memref<2x32x32xf32, #tpu.memory_space<vmem>>, %arg8: memref<2x1x32xf32, #tpu.memory_space<vmem>>, %arg9: memref<2x1x32xf32, #tpu.memory_space<vmem>>, %arg10: memref<2x1x32xf32, #tpu.memory_space<vmem>>, %arg11: memref<2x32x64xf32, #tpu.memory_space<vmem>>, %arg12: memref<2x1x64xf32, #tpu.memory_space<vmem>>, %arg13: memref<2x64x32xf32, #tpu.memory_space<vmem>>, %arg14: memref<2x1x32xf32, #tpu.memory_space<vmem>>, %arg15: memref<2x1x32xf32, #tpu.memory_space<vmem>>, %arg16: memref<2x1x32xf32, #tpu.memory_space<vmem>>, %arg17: memref<16x32xf32, #tpu.memory_space<vmem>>) attributes {dimension_semantics = [#tpu.dimension_semantics<arbitrary>], iteration_bounds = array<i64: 1>, scalar_prefetch = 0 : i64, scratch_operands = 0 : i64, tpu.core_type = #tpu.core_type<tc>, window_params = [{pipeline_mode = #tpu.pipeline_mode<synchronous>, transform_indices = @transform_0, window_bounds = array<i64: 16, 1>}, {pipeline_mode = #tpu.pipeline_mode<synchronous>, transform_indices = @transform_1, window_bounds = array<i64: 16, 32>}, {pipeline_mode = #tpu.pipeline_mode<synchronous>, transform_indices = @transform_2, window_bounds = array<i64: 1, 32>}, {pipeline_mode = #tpu.pipeline_mode<synchronous>, transform_indices = @transform_3, window_bounds = array<i64: 1, 32>}, {pipeline_mode = #tpu.pipeline_mode<synchronous>, transform_indices = @transform_4, window_bounds = array<i64: 2, 32, 96>}, {pipeline_mode = #tpu.pipeline_mode<synchronous>, transform_indices = @transform_5, window_bounds = array<i64: 2, 1, 96>}, {pipeline_mode = #tpu.pipeline_mode<synchronous>, transform_indices = @transform_6, window_bounds = array<i64: 2, 32, 32>}, {pipeline_mode = #tpu.pipeline_mode<synchronous>, transform_indices = @transform_7, window_bounds = array<i64: 2, 1, 32>}, {pipeline_mode = #tpu.pipeline_mode<synchronous>, transform_indices = @transform_8, window_bounds = array<i64: 2, 1, 32>}, {pipeline_mode = #tpu.pipeline_mode<synchronous>, transform_indices = @transform_9, window_bounds = array<i64: 2, 1, 32>}, {pipeline_mode = #tpu.pipeline_mode<synchronous>, transform_indices = @transform_10, window_bounds = array<i64: 2, 32, 64>}, {pipeline_mode = #tpu.pipeline_mode<synchronous>, transform_indices = @transform_11, window_bounds = array<i64: 2, 1, 64>}, {pipeline_mode = #tpu.pipeline_mode<synchronous>, transform_indices = @transform_12, window_bounds = array<i64: 2, 64, 32>}, {pipeline_mode = #tpu.pipeline_mode<synchronous>, transform_indices = @transform_13, window_bounds = array<i64: 2, 1, 32>}, {pipeline_mode = #tpu.pipeline_mode<synchronous>, transform_indices = @transform_14, window_bounds = array<i64: 2, 1, 32>}, {pipeline_mode = #tpu.pipeline_mode<synchronous>, transform_indices = @transform_15, window_bounds = array<i64: 2, 1, 32>}, {pipeline_mode = #tpu.pipeline_mode<synchronous>, transform_indices = @transform_16, window_bounds = array<i64: 16, 32>}]} {
    %c0 = arith.constant 0 : index
    %c0_0 = arith.constant 0 : index
    %0 = vector.load %arg1[%c0, %c0_0] : memref<16x1xf32, #tpu.memory_space<vmem>>, vector<16x1xf32>
    %c0_1 = arith.constant 0 : index
    %c0_2 = arith.constant 0 : index
    %1 = vector.load %arg3[%c0_1, %c0_2] : memref<1x32xf32, #tpu.memory_space<vmem>>, vector<1x32xf32>
    %2 = vector.broadcast %0 : vector<16x1xf32> to vector<16x32xf32>
    %3 = vector.broadcast %1 : vector<1x32xf32> to vector<16x32xf32>
    %4 = arith.mulf %2, %3 : vector<16x32xf32>
    %c0_3 = arith.constant 0 : index
    %c0_4 = arith.constant 0 : index
    %5 = vector.load %arg4[%c0_3, %c0_4] : memref<1x32xf32, #tpu.memory_space<vmem>>, vector<1x32xf32>
    %6 = vector.broadcast %5 : vector<1x32xf32> to vector<16x32xf32>
    %7 = arith.addf %4, %6 : vector<16x32xf32>
    %cst = arith.constant 5.65685415 : f32
    %8 = vector.broadcast %cst : f32 to vector<16x32xf32>
    %9 = arith.mulf %7, %8 : vector<16x32xf32>
    %c0_5 = arith.constant 0 : index
    %c0_6 = arith.constant 0 : index
    %10 = vector.load %arg2[%c0_5, %c0_6] : memref<16x32xf32, #tpu.memory_space<vmem>>, vector<16x32xf32>
    %11 = arith.addf %9, %10 : vector<16x32xf32>
    %c0_7 = arith.constant 0 : index
    %c0_8 = arith.constant 0 : index
    %c0_9 = arith.constant 0 : index
    %12 = vector.load %arg5[%c0_7, %c0_8, %c0_9] : memref<2x32x96xf32, #tpu.memory_space<vmem>>, vector<1x32x96xf32>
    %13 = vector.shape_cast %12 : vector<1x32x96xf32> to vector<32x96xf32>
    %c0_10 = arith.constant 0 : index
    %c0_11 = arith.constant 0 : index
    %c0_12 = arith.constant 0 : index
    %14 = vector.load %arg6[%c0_10, %c0_11, %c0_12] : memref<2x1x96xf32, #tpu.memory_space<vmem>>, vector<1x1x96xf32>
    %15 = vector.shape_cast %14 : vector<1x1x96xf32> to vector<1x96xf32>
    %c0_13 = arith.constant 0 : index
    %c0_14 = arith.constant 0 : index
    %c0_15 = arith.constant 0 : index
    %16 = vector.load %arg7[%c0_13, %c0_14, %c0_15] : memref<2x32x32xf32, #tpu.memory_space<vmem>>, vector<1x32x32xf32>
    %17 = vector.shape_cast %16 : vector<1x32x32xf32> to vector<32x32xf32>
    %c0_16 = arith.constant 0 : index
    %c0_17 = arith.constant 0 : index
    %c0_18 = arith.constant 0 : index
    %18 = vector.load %arg8[%c0_16, %c0_17, %c0_18] : memref<2x1x32xf32, #tpu.memory_space<vmem>>, vector<1x1x32xf32>
    %19 = vector.shape_cast %18 : vector<1x1x32xf32> to vector<1x32xf32>
    %c0_19 = arith.constant 0 : index
    %c0_20 = arith.constant 0 : index
    %c0_21 = arith.constant 0 : index
    %20 = vector.load %arg11[%c0_19, %c0_20, %c0_21] : memref<2x32x64xf32, #tpu.memory_space<vmem>>, vector<1x32x64xf32>
    %21 = vector.shape_cast %20 : vector<1x32x64xf32> to vector<32x64xf32>
    %c0_22 = arith.constant 0 : index
    %c0_23 = arith.constant 0 : index
    %c0_24 = arith.constant 0 : index
    %22 = vector.load %arg12[%c0_22, %c0_23, %c0_24] : memref<2x1x64xf32, #tpu.memory_space<vmem>>, vector<1x1x64xf32>
    %23 = vector.shape_cast %22 : vector<1x1x64xf32> to vector<1x64xf32>
    %c0_25 = arith.constant 0 : index
    %c0_26 = arith.constant 0 : index
    %c0_27 = arith.constant 0 : index
    %24 = vector.load %arg13[%c0_25, %c0_26, %c0_27] : memref<2x64x32xf32, #tpu.memory_space<vmem>>, vector<1x64x32xf32>
    %25 = vector.shape_cast %24 : vector<1x64x32xf32> to vector<64x32xf32>
    %c0_28 = arith.constant 0 : index
    %c0_29 = arith.constant 0 : index
    %c0_30 = arith.constant 0 : index
    %26 = vector.load %arg14[%c0_28, %c0_29, %c0_30] : memref<2x1x32xf32, #tpu.memory_space<vmem>>, vector<1x1x32xf32>
    %27 = vector.shape_cast %26 : vector<1x1x32xf32> to vector<1x32xf32>
    %cst_31 = arith.constant dense<0.000000e+00> : vector<16x96xf32>
    %28 = tpu.matmul %11, %13, %cst_31 {dimension_numbers = #tpu.dot_dimension_numbers<[1], [0], [0], [1], [0, 0, 1, 1], [], []>} : vector<16x32xf32>, vector<32x96xf32>, vector<16x96xf32> -> vector<16x96xf32>
    %29 = vector.broadcast %15 : vector<1x96xf32> to vector<16x96xf32>
    %30 = arith.addf %28, %29 : vector<16x96xf32>
    %cst_32 = arith.constant 0.000000e+00 : f32
    %31 = vector.broadcast %cst_32 : f32 to vector<16x32xf32>
    %32 = vector.extract_strided_slice %30 {offsets = [0, 0], sizes = [16, 8], strides = [1, 1]} : vector<16x96xf32> to vector<16x8xf32>
    %33 = vector.shape_cast %32 : vector<16x8xf32> to vector<2x8x8xf32>
    %34 = vector.extract_strided_slice %30 {offsets = [0, 32], sizes = [16, 8], strides = [1, 1]} : vector<16x96xf32> to vector<16x8xf32>
    %35 = vector.shape_cast %34 : vector<16x8xf32> to vector<2x8x8xf32>
    %36 = vector.extract_strided_slice %30 {offsets = [0, 64], sizes = [16, 8], strides = [1, 1]} : vector<16x96xf32> to vector<16x8xf32>
    %37 = vector.shape_cast %36 : vector<16x8xf32> to vector<2x8x8xf32>
    "tpu.trace_start"() <{level = 10 : i32, message = "bqd,bkd->bqk"}> : () -> ()
    %cst_33 = arith.constant dense<0.000000e+00> : vector<2x8x8xf32>
    %38 = tpu.matmul %33, %35, %cst_33 {dimension_numbers = #tpu.dot_dimension_numbers<[2], [2], [1], [1], [0, 0, 0, 1, 1, 1], [0], [0]>} : vector<2x8x8xf32>, vector<2x8x8xf32>, vector<2x8x8xf32> -> vector<2x8x8xf32>
    "tpu.trace_stop"() : () -> ()
    %cst_34 = arith.constant 0.353553385 : f32
    %39 = vector.broadcast %cst_34 : f32 to vector<2x8x8xf32>
    %40 = arith.mulf %38, %39 : vector<2x8x8xf32>
    %cst_35 = arith.constant dense<0xFF800000> : vector<2x8xf32>
    %41 = vector.multi_reduction <maximumf>, %40, %cst_35 [2] : vector<2x8x8xf32> to vector<2x8xf32>
    %42 = vector.shape_cast %41 : vector<2x8xf32> to vector<2x8x1xf32>
    %43 = vector.broadcast %42 : vector<2x8x1xf32> to vector<2x8x8xf32>
    %44 = arith.subf %40, %43 : vector<2x8x8xf32>
    %45 = math.exp %44 : vector<2x8x8xf32>
    %cst_36 = arith.constant dense<0.000000e+00> : vector<2x8xf32>
    %46 = vector.multi_reduction <add>, %45, %cst_36 [2] : vector<2x8x8xf32> to vector<2x8xf32>
    %47 = vector.shape_cast %46 : vector<2x8xf32> to vector<2x8x1xf32>
    %48 = tpu.reciprocal %47 {approx = true} : vector<2x8x1xf32> -> vector<2x8x1xf32>
    %49 = vector.broadcast %48 : vector<2x8x1xf32> to vector<2x8x8xf32>
    %50 = arith.mulf %45, %49 : vector<2x8x8xf32>
    "tpu.trace_start"() <{level = 10 : i32, message = "bqk,bkd->bqd"}> : () -> ()
    %cst_37 = arith.constant dense<0.000000e+00> : vector<2x8x8xf32>
    %51 = tpu.matmul %50, %37, %cst_37 {dimension_numbers = #tpu.dot_dimension_numbers<[2], [1], [1], [2], [0, 0, 0, 1, 1, 2], [0], [0]>} : vector<2x8x8xf32>, vector<2x8x8xf32>, vector<2x8x8xf32> -> vector<2x8x8xf32>
    "tpu.trace_stop"() : () -> ()
    %52 = vector.shape_cast %51 : vector<2x8x8xf32> to vector<16x8xf32>
    %53 = vector.extract_strided_slice %17 {offsets = [0, 0], sizes = [8, 32], strides = [1, 1]} : vector<32x32xf32> to vector<8x32xf32>
    %cst_38 = arith.constant dense<0.000000e+00> : vector<16x32xf32>
    %54 = tpu.matmul %52, %53, %cst_38 {dimension_numbers = #tpu.dot_dimension_numbers<[1], [0], [0], [1], [0, 0, 1, 1], [], []>} : vector<16x8xf32>, vector<8x32xf32>, vector<16x32xf32> -> vector<16x32xf32>
    %55 = arith.addf %31, %54 : vector<16x32xf32>
    %56 = vector.extract_strided_slice %30 {offsets = [0, 8], sizes = [16, 8], strides = [1, 1]} : vector<16x96xf32> to vector<16x8xf32>
    %57 = vector.shape_cast %56 : vector<16x8xf32> to vector<2x8x8xf32>
    %58 = vector.extract_strided_slice %30 {offsets = [0, 40], sizes = [16, 8], strides = [1, 1]} : vector<16x96xf32> to vector<16x8xf32>
    %59 = vector.shape_cast %58 : vector<16x8xf32> to vector<2x8x8xf32>
    %60 = vector.extract_strided_slice %30 {offsets = [0, 72], sizes = [16, 8], strides = [1, 1]} : vector<16x96xf32> to vector<16x8xf32>
    %61 = vector.shape_cast %60 : vector<16x8xf32> to vector<2x8x8xf32>
    "tpu.trace_start"() <{level = 10 : i32, message = "bqd,bkd->bqk"}> : () -> ()
    %cst_39 = arith.constant dense<0.000000e+00> : vector<2x8x8xf32>
    %62 = tpu.matmul %57, %59, %cst_39 {dimension_numbers = #tpu.dot_dimension_numbers<[2], [2], [1], [1], [0, 0, 0, 1, 1, 1], [0], [0]>} : vector<2x8x8xf32>, vector<2x8x8xf32>, vector<2x8x8xf32> -> vector<2x8x8xf32>
    "tpu.trace_stop"() : () -> ()
    %cst_40 = arith.constant 0.353553385 : f32
    %63 = vector.broadcast %cst_40 : f32 to vector<2x8x8xf32>
    %64 = arith.mulf %62, %63 : vector<2x8x8xf32>
    %cst_41 = arith.constant dense<0xFF800000> : vector<2x8xf32>
    %65 = vector.multi_reduction <maximumf>, %64, %cst_41 [2] : vector<2x8x8xf32> to vector<2x8xf32>
    %66 = vector.shape_cast %65 : vector<2x8xf32> to vector<2x8x1xf32>
    %67 = vector.broadcast %66 : vector<2x8x1xf32> to vector<2x8x8xf32>
    %68 = arith.subf %64, %67 : vector<2x8x8xf32>
    %69 = math.exp %68 : vector<2x8x8xf32>
    %cst_42 = arith.constant dense<0.000000e+00> : vector<2x8xf32>
    %70 = vector.multi_reduction <add>, %69, %cst_42 [2] : vector<2x8x8xf32> to vector<2x8xf32>
    %71 = vector.shape_cast %70 : vector<2x8xf32> to vector<2x8x1xf32>
    %72 = tpu.reciprocal %71 {approx = true} : vector<2x8x1xf32> -> vector<2x8x1xf32>
    %73 = vector.broadcast %72 : vector<2x8x1xf32> to vector<2x8x8xf32>
    %74 = arith.mulf %69, %73 : vector<2x8x8xf32>
    "tpu.trace_start"() <{level = 10 : i32, message = "bqk,bkd->bqd"}> : () -> ()
    %cst_43 = arith.constant dense<0.000000e+00> : vector<2x8x8xf32>
    %75 = tpu.matmul %74, %61, %cst_43 {dimension_numbers = #tpu.dot_dimension_numbers<[2], [1], [1], [2], [0, 0, 0, 1, 1, 2], [0], [0]>} : vector<2x8x8xf32>, vector<2x8x8xf32>, vector<2x8x8xf32> -> vector<2x8x8xf32>
    "tpu.trace_stop"() : () -> ()
    %76 = vector.shape_cast %75 : vector<2x8x8xf32> to vector<16x8xf32>
    %77 = vector.extract_strided_slice %17 {offsets = [8, 0], sizes = [8, 32], strides = [1, 1]} : vector<32x32xf32> to vector<8x32xf32>
    %cst_44 = arith.constant dense<0.000000e+00> : vector<16x32xf32>
    %78 = tpu.matmul %76, %77, %cst_44 {dimension_numbers = #tpu.dot_dimension_numbers<[1], [0], [0], [1], [0, 0, 1, 1], [], []>} : vector<16x8xf32>, vector<8x32xf32>, vector<16x32xf32> -> vector<16x32xf32>
    %79 = arith.addf %55, %78 : vector<16x32xf32>
    %80 = vector.extract_strided_slice %30 {offsets = [0, 16], sizes = [16, 8], strides = [1, 1]} : vector<16x96xf32> to vector<16x8xf32>
    %81 = vector.shape_cast %80 : vector<16x8xf32> to vector<2x8x8xf32>
    %82 = vector.extract_strided_slice %30 {offsets = [0, 48], sizes = [16, 8], strides = [1, 1]} : vector<16x96xf32> to vector<16x8xf32>
    %83 = vector.shape_cast %82 : vector<16x8xf32> to vector<2x8x8xf32>
    %84 = vector.extract_strided_slice %30 {offsets = [0, 80], sizes = [16, 8], strides = [1, 1]} : vector<16x96xf32> to vector<16x8xf32>
    %85 = vector.shape_cast %84 : vector<16x8xf32> to vector<2x8x8xf32>
    "tpu.trace_start"() <{level = 10 : i32, message = "bqd,bkd->bqk"}> : () -> ()
    %cst_45 = arith.constant dense<0.000000e+00> : vector<2x8x8xf32>
    %86 = tpu.matmul %81, %83, %cst_45 {dimension_numbers = #tpu.dot_dimension_numbers<[2], [2], [1], [1], [0, 0, 0, 1, 1, 1], [0], [0]>} : vector<2x8x8xf32>, vector<2x8x8xf32>, vector<2x8x8xf32> -> vector<2x8x8xf32>
    "tpu.trace_stop"() : () -> ()
    %cst_46 = arith.constant 0.353553385 : f32
    %87 = vector.broadcast %cst_46 : f32 to vector<2x8x8xf32>
    %88 = arith.mulf %86, %87 : vector<2x8x8xf32>
    %cst_47 = arith.constant dense<0xFF800000> : vector<2x8xf32>
    %89 = vector.multi_reduction <maximumf>, %88, %cst_47 [2] : vector<2x8x8xf32> to vector<2x8xf32>
    %90 = vector.shape_cast %89 : vector<2x8xf32> to vector<2x8x1xf32>
    %91 = vector.broadcast %90 : vector<2x8x1xf32> to vector<2x8x8xf32>
    %92 = arith.subf %88, %91 : vector<2x8x8xf32>
    %93 = math.exp %92 : vector<2x8x8xf32>
    %cst_48 = arith.constant dense<0.000000e+00> : vector<2x8xf32>
    %94 = vector.multi_reduction <add>, %93, %cst_48 [2] : vector<2x8x8xf32> to vector<2x8xf32>
    %95 = vector.shape_cast %94 : vector<2x8xf32> to vector<2x8x1xf32>
    %96 = tpu.reciprocal %95 {approx = true} : vector<2x8x1xf32> -> vector<2x8x1xf32>
    %97 = vector.broadcast %96 : vector<2x8x1xf32> to vector<2x8x8xf32>
    %98 = arith.mulf %93, %97 : vector<2x8x8xf32>
    "tpu.trace_start"() <{level = 10 : i32, message = "bqk,bkd->bqd"}> : () -> ()
    %cst_49 = arith.constant dense<0.000000e+00> : vector<2x8x8xf32>
    %99 = tpu.matmul %98, %85, %cst_49 {dimension_numbers = #tpu.dot_dimension_numbers<[2], [1], [1], [2], [0, 0, 0, 1, 1, 2], [0], [0]>} : vector<2x8x8xf32>, vector<2x8x8xf32>, vector<2x8x8xf32> -> vector<2x8x8xf32>
    "tpu.trace_stop"() : () -> ()
    %100 = vector.shape_cast %99 : vector<2x8x8xf32> to vector<16x8xf32>
    %101 = vector.extract_strided_slice %17 {offsets = [16, 0], sizes = [8, 32], strides = [1, 1]} : vector<32x32xf32> to vector<8x32xf32>
    %cst_50 = arith.constant dense<0.000000e+00> : vector<16x32xf32>
    %102 = tpu.matmul %100, %101, %cst_50 {dimension_numbers = #tpu.dot_dimension_numbers<[1], [0], [0], [1], [0, 0, 1, 1], [], []>} : vector<16x8xf32>, vector<8x32xf32>, vector<16x32xf32> -> vector<16x32xf32>
    %103 = arith.addf %79, %102 : vector<16x32xf32>
    %104 = vector.extract_strided_slice %30 {offsets = [0, 24], sizes = [16, 8], strides = [1, 1]} : vector<16x96xf32> to vector<16x8xf32>
    %105 = vector.shape_cast %104 : vector<16x8xf32> to vector<2x8x8xf32>
    %106 = vector.extract_strided_slice %30 {offsets = [0, 56], sizes = [16, 8], strides = [1, 1]} : vector<16x96xf32> to vector<16x8xf32>
    %107 = vector.shape_cast %106 : vector<16x8xf32> to vector<2x8x8xf32>
    %108 = vector.extract_strided_slice %30 {offsets = [0, 88], sizes = [16, 8], strides = [1, 1]} : vector<16x96xf32> to vector<16x8xf32>
    %109 = vector.shape_cast %108 : vector<16x8xf32> to vector<2x8x8xf32>
    "tpu.trace_start"() <{level = 10 : i32, message = "bqd,bkd->bqk"}> : () -> ()
    %cst_51 = arith.constant dense<0.000000e+00> : vector<2x8x8xf32>
    %110 = tpu.matmul %105, %107, %cst_51 {dimension_numbers = #tpu.dot_dimension_numbers<[2], [2], [1], [1], [0, 0, 0, 1, 1, 1], [0], [0]>} : vector<2x8x8xf32>, vector<2x8x8xf32>, vector<2x8x8xf32> -> vector<2x8x8xf32>
    "tpu.trace_stop"() : () -> ()
    %cst_52 = arith.constant 0.353553385 : f32
    %111 = vector.broadcast %cst_52 : f32 to vector<2x8x8xf32>
    %112 = arith.mulf %110, %111 : vector<2x8x8xf32>
    %cst_53 = arith.constant dense<0xFF800000> : vector<2x8xf32>
    %113 = vector.multi_reduction <maximumf>, %112, %cst_53 [2] : vector<2x8x8xf32> to vector<2x8xf32>
    %114 = vector.shape_cast %113 : vector<2x8xf32> to vector<2x8x1xf32>
    %115 = vector.broadcast %114 : vector<2x8x1xf32> to vector<2x8x8xf32>
    %116 = arith.subf %112, %115 : vector<2x8x8xf32>
    %117 = math.exp %116 : vector<2x8x8xf32>
    %cst_54 = arith.constant dense<0.000000e+00> : vector<2x8xf32>
    %118 = vector.multi_reduction <add>, %117, %cst_54 [2] : vector<2x8x8xf32> to vector<2x8xf32>
    %119 = vector.shape_cast %118 : vector<2x8xf32> to vector<2x8x1xf32>
    %120 = tpu.reciprocal %119 {approx = true} : vector<2x8x1xf32> -> vector<2x8x1xf32>
    %121 = vector.broadcast %120 : vector<2x8x1xf32> to vector<2x8x8xf32>
    %122 = arith.mulf %117, %121 : vector<2x8x8xf32>
    "tpu.trace_start"() <{level = 10 : i32, message = "bqk,bkd->bqd"}> : () -> ()
    %cst_55 = arith.constant dense<0.000000e+00> : vector<2x8x8xf32>
    %123 = tpu.matmul %122, %109, %cst_55 {dimension_numbers = #tpu.dot_dimension_numbers<[2], [1], [1], [2], [0, 0, 0, 1, 1, 2], [0], [0]>} : vector<2x8x8xf32>, vector<2x8x8xf32>, vector<2x8x8xf32> -> vector<2x8x8xf32>
    "tpu.trace_stop"() : () -> ()
    %124 = vector.shape_cast %123 : vector<2x8x8xf32> to vector<16x8xf32>
    %125 = vector.extract_strided_slice %17 {offsets = [24, 0], sizes = [8, 32], strides = [1, 1]} : vector<32x32xf32> to vector<8x32xf32>
    %cst_56 = arith.constant dense<0.000000e+00> : vector<16x32xf32>
    %126 = tpu.matmul %124, %125, %cst_56 {dimension_numbers = #tpu.dot_dimension_numbers<[1], [0], [0], [1], [0, 0, 1, 1], [], []>} : vector<16x8xf32>, vector<8x32xf32>, vector<16x32xf32> -> vector<16x32xf32>
    %127 = arith.addf %103, %126 : vector<16x32xf32>
    %128 = vector.broadcast %19 : vector<1x32xf32> to vector<16x32xf32>
    %129 = arith.addf %127, %128 : vector<16x32xf32>
    %130 = arith.addf %11, %129 : vector<16x32xf32>
    %c0_57 = arith.constant 0 : index
    %c0_58 = arith.constant 0 : index
    %c0_59 = arith.constant 0 : index
    %131 = vector.load %arg9[%c0_57, %c0_58, %c0_59] : memref<2x1x32xf32, #tpu.memory_space<vmem>>, vector<1x1x32xf32>
    %132 = vector.shape_cast %131 : vector<1x1x32xf32> to vector<1x32xf32>
    %c0_60 = arith.constant 0 : index
    %c0_61 = arith.constant 0 : index
    %c0_62 = arith.constant 0 : index
    %133 = vector.load %arg10[%c0_60, %c0_61, %c0_62] : memref<2x1x32xf32, #tpu.memory_space<vmem>>, vector<1x1x32xf32>
    %134 = vector.shape_cast %133 : vector<1x1x32xf32> to vector<1x32xf32>
    %cst_63 = arith.constant dense<0.000000e+00> : vector<16xf32>
    %135 = vector.multi_reduction <add>, %130, %cst_63 [1] : vector<16x32xf32> to vector<16xf32>
    %136 = vector.shape_cast %135 : vector<16xf32> to vector<16x1xf32>
    %cst_64 = arith.constant 3.200000e+01 : f32
    %137 = vector.broadcast %cst_64 : f32 to vector<16x1xf32>
    %138 = arith.divf %136, %137 : vector<16x1xf32>
    %139 = vector.broadcast %138 : vector<16x1xf32> to vector<16x32xf32>
    %140 = arith.subf %130, %139 : vector<16x32xf32>
    %141 = arith.mulf %140, %140 : vector<16x32xf32>
    %cst_65 = arith.constant dense<0.000000e+00> : vector<16xf32>
    %142 = vector.multi_reduction <add>, %141, %cst_65 [1] : vector<16x32xf32> to vector<16xf32>
    %143 = vector.shape_cast %142 : vector<16xf32> to vector<16x1xf32>
    %cst_66 = arith.constant 3.200000e+01 : f32
    %144 = vector.broadcast %cst_66 : f32 to vector<16x1xf32>
    %145 = arith.divf %143, %144 : vector<16x1xf32>
    %146 = vector.broadcast %138 : vector<16x1xf32> to vector<16x32xf32>
    %147 = arith.subf %130, %146 : vector<16x32xf32>
    %cst_67 = arith.constant 9.99999974E-6 : f32
    %148 = vector.broadcast %cst_67 : f32 to vector<16x1xf32>
    %149 = arith.addf %145, %148 : vector<16x1xf32>
    %150 = math.rsqrt %149 : vector<16x1xf32>
    %151 = vector.broadcast %150 : vector<16x1xf32> to vector<16x32xf32>
    %152 = arith.mulf %147, %151 : vector<16x32xf32>
    %153 = vector.broadcast %132 : vector<1x32xf32> to vector<16x32xf32>
    %154 = arith.mulf %152, %153 : vector<16x32xf32>
    %155 = vector.broadcast %134 : vector<1x32xf32> to vector<16x32xf32>
    %156 = arith.addf %154, %155 : vector<16x32xf32>
    %cst_68 = arith.constant dense<0.000000e+00> : vector<16x64xf32>
    %157 = tpu.matmul %156, %21, %cst_68 {dimension_numbers = #tpu.dot_dimension_numbers<[1], [0], [0], [1], [0, 0, 1, 1], [], []>} : vector<16x32xf32>, vector<32x64xf32>, vector<16x64xf32> -> vector<16x64xf32>
    %158 = vector.broadcast %23 : vector<1x64xf32> to vector<16x64xf32>
    %159 = arith.addf %157, %158 : vector<16x64xf32>
    %cst_69 = arith.constant 0.000000e+00 : f32
    %160 = vector.broadcast %cst_69 : f32 to vector<16x64xf32>
    %161 = arith.maximumf %159, %160 : vector<16x64xf32>
    %cst_70 = arith.constant dense<0.000000e+00> : vector<16x32xf32>
    %162 = tpu.matmul %161, %25, %cst_70 {dimension_numbers = #tpu.dot_dimension_numbers<[1], [0], [0], [1], [0, 0, 1, 1], [], []>} : vector<16x64xf32>, vector<64x32xf32>, vector<16x32xf32> -> vector<16x32xf32>
    %163 = vector.broadcast %27 : vector<1x32xf32> to vector<16x32xf32>
    %164 = arith.addf %162, %163 : vector<16x32xf32>
    %165 = arith.addf %156, %164 : vector<16x32xf32>
    %c0_71 = arith.constant 0 : index
    %c0_72 = arith.constant 0 : index
    %c0_73 = arith.constant 0 : index
    %166 = vector.load %arg15[%c0_71, %c0_72, %c0_73] : memref<2x1x32xf32, #tpu.memory_space<vmem>>, vector<1x1x32xf32>
    %167 = vector.shape_cast %166 : vector<1x1x32xf32> to vector<1x32xf32>
    %c0_74 = arith.constant 0 : index
    %c0_75 = arith.constant 0 : index
    %c0_76 = arith.constant 0 : index
    %168 = vector.load %arg16[%c0_74, %c0_75, %c0_76] : memref<2x1x32xf32, #tpu.memory_space<vmem>>, vector<1x1x32xf32>
    %169 = vector.shape_cast %168 : vector<1x1x32xf32> to vector<1x32xf32>
    %cst_77 = arith.constant dense<0.000000e+00> : vector<16xf32>
    %170 = vector.multi_reduction <add>, %165, %cst_77 [1] : vector<16x32xf32> to vector<16xf32>
    %171 = vector.shape_cast %170 : vector<16xf32> to vector<16x1xf32>
    %cst_78 = arith.constant 3.200000e+01 : f32
    %172 = vector.broadcast %cst_78 : f32 to vector<16x1xf32>
    %173 = arith.divf %171, %172 : vector<16x1xf32>
    %174 = vector.broadcast %173 : vector<16x1xf32> to vector<16x32xf32>
    %175 = arith.subf %165, %174 : vector<16x32xf32>
    %176 = arith.mulf %175, %175 : vector<16x32xf32>
    %cst_79 = arith.constant dense<0.000000e+00> : vector<16xf32>
    %177 = vector.multi_reduction <add>, %176, %cst_79 [1] : vector<16x32xf32> to vector<16xf32>
    %178 = vector.shape_cast %177 : vector<16xf32> to vector<16x1xf32>
    %cst_80 = arith.constant 3.200000e+01 : f32
    %179 = vector.broadcast %cst_80 : f32 to vector<16x1xf32>
    %180 = arith.divf %178, %179 : vector<16x1xf32>
    %181 = vector.broadcast %173 : vector<16x1xf32> to vector<16x32xf32>
    %182 = arith.subf %165, %181 : vector<16x32xf32>
    %cst_81 = arith.constant 9.99999974E-6 : f32
    %183 = vector.broadcast %cst_81 : f32 to vector<16x1xf32>
    %184 = arith.addf %180, %183 : vector<16x1xf32>
    %185 = math.rsqrt %184 : vector<16x1xf32>
    %186 = vector.broadcast %185 : vector<16x1xf32> to vector<16x32xf32>
    %187 = arith.mulf %182, %186 : vector<16x32xf32>
    %188 = vector.broadcast %167 : vector<1x32xf32> to vector<16x32xf32>
    %189 = arith.mulf %187, %188 : vector<16x32xf32>
    %190 = vector.broadcast %169 : vector<1x32xf32> to vector<16x32xf32>
    %191 = arith.addf %189, %190 : vector<16x32xf32>
    %c1 = arith.constant 1 : index
    %c0_82 = arith.constant 0 : index
    %c0_83 = arith.constant 0 : index
    %192 = vector.load %arg5[%c1, %c0_82, %c0_83] : memref<2x32x96xf32, #tpu.memory_space<vmem>>, vector<1x32x96xf32>
    %193 = vector.shape_cast %192 : vector<1x32x96xf32> to vector<32x96xf32>
    %c1_84 = arith.constant 1 : index
    %c0_85 = arith.constant 0 : index
    %c0_86 = arith.constant 0 : index
    %194 = vector.load %arg6[%c1_84, %c0_85, %c0_86] : memref<2x1x96xf32, #tpu.memory_space<vmem>>, vector<1x1x96xf32>
    %195 = vector.shape_cast %194 : vector<1x1x96xf32> to vector<1x96xf32>
    %c1_87 = arith.constant 1 : index
    %c0_88 = arith.constant 0 : index
    %c0_89 = arith.constant 0 : index
    %196 = vector.load %arg7[%c1_87, %c0_88, %c0_89] : memref<2x32x32xf32, #tpu.memory_space<vmem>>, vector<1x32x32xf32>
    %197 = vector.shape_cast %196 : vector<1x32x32xf32> to vector<32x32xf32>
    %c1_90 = arith.constant 1 : index
    %c0_91 = arith.constant 0 : index
    %c0_92 = arith.constant 0 : index
    %198 = vector.load %arg8[%c1_90, %c0_91, %c0_92] : memref<2x1x32xf32, #tpu.memory_space<vmem>>, vector<1x1x32xf32>
    %199 = vector.shape_cast %198 : vector<1x1x32xf32> to vector<1x32xf32>
    %c1_93 = arith.constant 1 : index
    %c0_94 = arith.constant 0 : index
    %c0_95 = arith.constant 0 : index
    %200 = vector.load %arg11[%c1_93, %c0_94, %c0_95] : memref<2x32x64xf32, #tpu.memory_space<vmem>>, vector<1x32x64xf32>
    %201 = vector.shape_cast %200 : vector<1x32x64xf32> to vector<32x64xf32>
    %c1_96 = arith.constant 1 : index
    %c0_97 = arith.constant 0 : index
    %c0_98 = arith.constant 0 : index
    %202 = vector.load %arg12[%c1_96, %c0_97, %c0_98] : memref<2x1x64xf32, #tpu.memory_space<vmem>>, vector<1x1x64xf32>
    %203 = vector.shape_cast %202 : vector<1x1x64xf32> to vector<1x64xf32>
    %c1_99 = arith.constant 1 : index
    %c0_100 = arith.constant 0 : index
    %c0_101 = arith.constant 0 : index
    %204 = vector.load %arg13[%c1_99, %c0_100, %c0_101] : memref<2x64x32xf32, #tpu.memory_space<vmem>>, vector<1x64x32xf32>
    %205 = vector.shape_cast %204 : vector<1x64x32xf32> to vector<64x32xf32>
    %c1_102 = arith.constant 1 : index
    %c0_103 = arith.constant 0 : index
    %c0_104 = arith.constant 0 : index
    %206 = vector.load %arg14[%c1_102, %c0_103, %c0_104] : memref<2x1x32xf32, #tpu.memory_space<vmem>>, vector<1x1x32xf32>
    %207 = vector.shape_cast %206 : vector<1x1x32xf32> to vector<1x32xf32>
    %cst_105 = arith.constant dense<0.000000e+00> : vector<16x96xf32>
    %208 = tpu.matmul %191, %193, %cst_105 {dimension_numbers = #tpu.dot_dimension_numbers<[1], [0], [0], [1], [0, 0, 1, 1], [], []>} : vector<16x32xf32>, vector<32x96xf32>, vector<16x96xf32> -> vector<16x96xf32>
    %209 = vector.broadcast %195 : vector<1x96xf32> to vector<16x96xf32>
    %210 = arith.addf %208, %209 : vector<16x96xf32>
    %cst_106 = arith.constant 0.000000e+00 : f32
    %211 = vector.broadcast %cst_106 : f32 to vector<16x32xf32>
    %212 = vector.extract_strided_slice %210 {offsets = [0, 0], sizes = [16, 8], strides = [1, 1]} : vector<16x96xf32> to vector<16x8xf32>
    %213 = vector.shape_cast %212 : vector<16x8xf32> to vector<2x8x8xf32>
    %214 = vector.extract_strided_slice %210 {offsets = [0, 32], sizes = [16, 8], strides = [1, 1]} : vector<16x96xf32> to vector<16x8xf32>
    %215 = vector.shape_cast %214 : vector<16x8xf32> to vector<2x8x8xf32>
    %216 = vector.extract_strided_slice %210 {offsets = [0, 64], sizes = [16, 8], strides = [1, 1]} : vector<16x96xf32> to vector<16x8xf32>
    %217 = vector.shape_cast %216 : vector<16x8xf32> to vector<2x8x8xf32>
    "tpu.trace_start"() <{level = 10 : i32, message = "bqd,bkd->bqk"}> : () -> ()
    %cst_107 = arith.constant dense<0.000000e+00> : vector<2x8x8xf32>
    %218 = tpu.matmul %213, %215, %cst_107 {dimension_numbers = #tpu.dot_dimension_numbers<[2], [2], [1], [1], [0, 0, 0, 1, 1, 1], [0], [0]>} : vector<2x8x8xf32>, vector<2x8x8xf32>, vector<2x8x8xf32> -> vector<2x8x8xf32>
    "tpu.trace_stop"() : () -> ()
    %cst_108 = arith.constant 0.353553385 : f32
    %219 = vector.broadcast %cst_108 : f32 to vector<2x8x8xf32>
    %220 = arith.mulf %218, %219 : vector<2x8x8xf32>
    %cst_109 = arith.constant dense<0xFF800000> : vector<2x8xf32>
    %221 = vector.multi_reduction <maximumf>, %220, %cst_109 [2] : vector<2x8x8xf32> to vector<2x8xf32>
    %222 = vector.shape_cast %221 : vector<2x8xf32> to vector<2x8x1xf32>
    %223 = vector.broadcast %222 : vector<2x8x1xf32> to vector<2x8x8xf32>
    %224 = arith.subf %220, %223 : vector<2x8x8xf32>
    %225 = math.exp %224 : vector<2x8x8xf32>
    %cst_110 = arith.constant dense<0.000000e+00> : vector<2x8xf32>
    %226 = vector.multi_reduction <add>, %225, %cst_110 [2] : vector<2x8x8xf32> to vector<2x8xf32>
    %227 = vector.shape_cast %226 : vector<2x8xf32> to vector<2x8x1xf32>
    %228 = tpu.reciprocal %227 {approx = true} : vector<2x8x1xf32> -> vector<2x8x1xf32>
    %229 = vector.broadcast %228 : vector<2x8x1xf32> to vector<2x8x8xf32>
    %230 = arith.mulf %225, %229 : vector<2x8x8xf32>
    "tpu.trace_start"() <{level = 10 : i32, message = "bqk,bkd->bqd"}> : () -> ()
    %cst_111 = arith.constant dense<0.000000e+00> : vector<2x8x8xf32>
    %231 = tpu.matmul %230, %217, %cst_111 {dimension_numbers = #tpu.dot_dimension_numbers<[2], [1], [1], [2], [0, 0, 0, 1, 1, 2], [0], [0]>} : vector<2x8x8xf32>, vector<2x8x8xf32>, vector<2x8x8xf32> -> vector<2x8x8xf32>
    "tpu.trace_stop"() : () -> ()
    %232 = vector.shape_cast %231 : vector<2x8x8xf32> to vector<16x8xf32>
    %233 = vector.extract_strided_slice %197 {offsets = [0, 0], sizes = [8, 32], strides = [1, 1]} : vector<32x32xf32> to vector<8x32xf32>
    %cst_112 = arith.constant dense<0.000000e+00> : vector<16x32xf32>
    %234 = tpu.matmul %232, %233, %cst_112 {dimension_numbers = #tpu.dot_dimension_numbers<[1], [0], [0], [1], [0, 0, 1, 1], [], []>} : vector<16x8xf32>, vector<8x32xf32>, vector<16x32xf32> -> vector<16x32xf32>
    %235 = arith.addf %211, %234 : vector<16x32xf32>
    %236 = vector.extract_strided_slice %210 {offsets = [0, 8], sizes = [16, 8], strides = [1, 1]} : vector<16x96xf32> to vector<16x8xf32>
    %237 = vector.shape_cast %236 : vector<16x8xf32> to vector<2x8x8xf32>
    %238 = vector.extract_strided_slice %210 {offsets = [0, 40], sizes = [16, 8], strides = [1, 1]} : vector<16x96xf32> to vector<16x8xf32>
    %239 = vector.shape_cast %238 : vector<16x8xf32> to vector<2x8x8xf32>
    %240 = vector.extract_strided_slice %210 {offsets = [0, 72], sizes = [16, 8], strides = [1, 1]} : vector<16x96xf32> to vector<16x8xf32>
    %241 = vector.shape_cast %240 : vector<16x8xf32> to vector<2x8x8xf32>
    "tpu.trace_start"() <{level = 10 : i32, message = "bqd,bkd->bqk"}> : () -> ()
    %cst_113 = arith.constant dense<0.000000e+00> : vector<2x8x8xf32>
    %242 = tpu.matmul %237, %239, %cst_113 {dimension_numbers = #tpu.dot_dimension_numbers<[2], [2], [1], [1], [0, 0, 0, 1, 1, 1], [0], [0]>} : vector<2x8x8xf32>, vector<2x8x8xf32>, vector<2x8x8xf32> -> vector<2x8x8xf32>
    "tpu.trace_stop"() : () -> ()
    %cst_114 = arith.constant 0.353553385 : f32
    %243 = vector.broadcast %cst_114 : f32 to vector<2x8x8xf32>
    %244 = arith.mulf %242, %243 : vector<2x8x8xf32>
    %cst_115 = arith.constant dense<0xFF800000> : vector<2x8xf32>
    %245 = vector.multi_reduction <maximumf>, %244, %cst_115 [2] : vector<2x8x8xf32> to vector<2x8xf32>
    %246 = vector.shape_cast %245 : vector<2x8xf32> to vector<2x8x1xf32>
    %247 = vector.broadcast %246 : vector<2x8x1xf32> to vector<2x8x8xf32>
    %248 = arith.subf %244, %247 : vector<2x8x8xf32>
    %249 = math.exp %248 : vector<2x8x8xf32>
    %cst_116 = arith.constant dense<0.000000e+00> : vector<2x8xf32>
    %250 = vector.multi_reduction <add>, %249, %cst_116 [2] : vector<2x8x8xf32> to vector<2x8xf32>
    %251 = vector.shape_cast %250 : vector<2x8xf32> to vector<2x8x1xf32>
    %252 = tpu.reciprocal %251 {approx = true} : vector<2x8x1xf32> -> vector<2x8x1xf32>
    %253 = vector.broadcast %252 : vector<2x8x1xf32> to vector<2x8x8xf32>
    %254 = arith.mulf %249, %253 : vector<2x8x8xf32>
    "tpu.trace_start"() <{level = 10 : i32, message = "bqk,bkd->bqd"}> : () -> ()
    %cst_117 = arith.constant dense<0.000000e+00> : vector<2x8x8xf32>
    %255 = tpu.matmul %254, %241, %cst_117 {dimension_numbers = #tpu.dot_dimension_numbers<[2], [1], [1], [2], [0, 0, 0, 1, 1, 2], [0], [0]>} : vector<2x8x8xf32>, vector<2x8x8xf32>, vector<2x8x8xf32> -> vector<2x8x8xf32>
    "tpu.trace_stop"() : () -> ()
    %256 = vector.shape_cast %255 : vector<2x8x8xf32> to vector<16x8xf32>
    %257 = vector.extract_strided_slice %197 {offsets = [8, 0], sizes = [8, 32], strides = [1, 1]} : vector<32x32xf32> to vector<8x32xf32>
    %cst_118 = arith.constant dense<0.000000e+00> : vector<16x32xf32>
    %258 = tpu.matmul %256, %257, %cst_118 {dimension_numbers = #tpu.dot_dimension_numbers<[1], [0], [0], [1], [0, 0, 1, 1], [], []>} : vector<16x8xf32>, vector<8x32xf32>, vector<16x32xf32> -> vector<16x32xf32>
    %259 = arith.addf %235, %258 : vector<16x32xf32>
    %260 = vector.extract_strided_slice %210 {offsets = [0, 16], sizes = [16, 8], strides = [1, 1]} : vector<16x96xf32> to vector<16x8xf32>
    %261 = vector.shape_cast %260 : vector<16x8xf32> to vector<2x8x8xf32>
    %262 = vector.extract_strided_slice %210 {offsets = [0, 48], sizes = [16, 8], strides = [1, 1]} : vector<16x96xf32> to vector<16x8xf32>
    %263 = vector.shape_cast %262 : vector<16x8xf32> to vector<2x8x8xf32>
    %264 = vector.extract_strided_slice %210 {offsets = [0, 80], sizes = [16, 8], strides = [1, 1]} : vector<16x96xf32> to vector<16x8xf32>
    %265 = vector.shape_cast %264 : vector<16x8xf32> to vector<2x8x8xf32>
    "tpu.trace_start"() <{level = 10 : i32, message = "bqd,bkd->bqk"}> : () -> ()
    %cst_119 = arith.constant dense<0.000000e+00> : vector<2x8x8xf32>
    %266 = tpu.matmul %261, %263, %cst_119 {dimension_numbers = #tpu.dot_dimension_numbers<[2], [2], [1], [1], [0, 0, 0, 1, 1, 1], [0], [0]>} : vector<2x8x8xf32>, vector<2x8x8xf32>, vector<2x8x8xf32> -> vector<2x8x8xf32>
    "tpu.trace_stop"() : () -> ()
    %cst_120 = arith.constant 0.353553385 : f32
    %267 = vector.broadcast %cst_120 : f32 to vector<2x8x8xf32>
    %268 = arith.mulf %266, %267 : vector<2x8x8xf32>
    %cst_121 = arith.constant dense<0xFF800000> : vector<2x8xf32>
    %269 = vector.multi_reduction <maximumf>, %268, %cst_121 [2] : vector<2x8x8xf32> to vector<2x8xf32>
    %270 = vector.shape_cast %269 : vector<2x8xf32> to vector<2x8x1xf32>
    %271 = vector.broadcast %270 : vector<2x8x1xf32> to vector<2x8x8xf32>
    %272 = arith.subf %268, %271 : vector<2x8x8xf32>
    %273 = math.exp %272 : vector<2x8x8xf32>
    %cst_122 = arith.constant dense<0.000000e+00> : vector<2x8xf32>
    %274 = vector.multi_reduction <add>, %273, %cst_122 [2] : vector<2x8x8xf32> to vector<2x8xf32>
    %275 = vector.shape_cast %274 : vector<2x8xf32> to vector<2x8x1xf32>
    %276 = tpu.reciprocal %275 {approx = true} : vector<2x8x1xf32> -> vector<2x8x1xf32>
    %277 = vector.broadcast %276 : vector<2x8x1xf32> to vector<2x8x8xf32>
    %278 = arith.mulf %273, %277 : vector<2x8x8xf32>
    "tpu.trace_start"() <{level = 10 : i32, message = "bqk,bkd->bqd"}> : () -> ()
    %cst_123 = arith.constant dense<0.000000e+00> : vector<2x8x8xf32>
    %279 = tpu.matmul %278, %265, %cst_123 {dimension_numbers = #tpu.dot_dimension_numbers<[2], [1], [1], [2], [0, 0, 0, 1, 1, 2], [0], [0]>} : vector<2x8x8xf32>, vector<2x8x8xf32>, vector<2x8x8xf32> -> vector<2x8x8xf32>
    "tpu.trace_stop"() : () -> ()
    %280 = vector.shape_cast %279 : vector<2x8x8xf32> to vector<16x8xf32>
    %281 = vector.extract_strided_slice %197 {offsets = [16, 0], sizes = [8, 32], strides = [1, 1]} : vector<32x32xf32> to vector<8x32xf32>
    %cst_124 = arith.constant dense<0.000000e+00> : vector<16x32xf32>
    %282 = tpu.matmul %280, %281, %cst_124 {dimension_numbers = #tpu.dot_dimension_numbers<[1], [0], [0], [1], [0, 0, 1, 1], [], []>} : vector<16x8xf32>, vector<8x32xf32>, vector<16x32xf32> -> vector<16x32xf32>
    %283 = arith.addf %259, %282 : vector<16x32xf32>
    %284 = vector.extract_strided_slice %210 {offsets = [0, 24], sizes = [16, 8], strides = [1, 1]} : vector<16x96xf32> to vector<16x8xf32>
    %285 = vector.shape_cast %284 : vector<16x8xf32> to vector<2x8x8xf32>
    %286 = vector.extract_strided_slice %210 {offsets = [0, 56], sizes = [16, 8], strides = [1, 1]} : vector<16x96xf32> to vector<16x8xf32>
    %287 = vector.shape_cast %286 : vector<16x8xf32> to vector<2x8x8xf32>
    %288 = vector.extract_strided_slice %210 {offsets = [0, 88], sizes = [16, 8], strides = [1, 1]} : vector<16x96xf32> to vector<16x8xf32>
    %289 = vector.shape_cast %288 : vector<16x8xf32> to vector<2x8x8xf32>
    "tpu.trace_start"() <{level = 10 : i32, message = "bqd,bkd->bqk"}> : () -> ()
    %cst_125 = arith.constant dense<0.000000e+00> : vector<2x8x8xf32>
    %290 = tpu.matmul %285, %287, %cst_125 {dimension_numbers = #tpu.dot_dimension_numbers<[2], [2], [1], [1], [0, 0, 0, 1, 1, 1], [0], [0]>} : vector<2x8x8xf32>, vector<2x8x8xf32>, vector<2x8x8xf32> -> vector<2x8x8xf32>
    "tpu.trace_stop"() : () -> ()
    %cst_126 = arith.constant 0.353553385 : f32
    %291 = vector.broadcast %cst_126 : f32 to vector<2x8x8xf32>
    %292 = arith.mulf %290, %291 : vector<2x8x8xf32>
    %cst_127 = arith.constant dense<0xFF800000> : vector<2x8xf32>
    %293 = vector.multi_reduction <maximumf>, %292, %cst_127 [2] : vector<2x8x8xf32> to vector<2x8xf32>
    %294 = vector.shape_cast %293 : vector<2x8xf32> to vector<2x8x1xf32>
    %295 = vector.broadcast %294 : vector<2x8x1xf32> to vector<2x8x8xf32>
    %296 = arith.subf %292, %295 : vector<2x8x8xf32>
    %297 = math.exp %296 : vector<2x8x8xf32>
    %cst_128 = arith.constant dense<0.000000e+00> : vector<2x8xf32>
    %298 = vector.multi_reduction <add>, %297, %cst_128 [2] : vector<2x8x8xf32> to vector<2x8xf32>
    %299 = vector.shape_cast %298 : vector<2x8xf32> to vector<2x8x1xf32>
    %300 = tpu.reciprocal %299 {approx = true} : vector<2x8x1xf32> -> vector<2x8x1xf32>
    %301 = vector.broadcast %300 : vector<2x8x1xf32> to vector<2x8x8xf32>
    %302 = arith.mulf %297, %301 : vector<2x8x8xf32>
    "tpu.trace_start"() <{level = 10 : i32, message = "bqk,bkd->bqd"}> : () -> ()
    %cst_129 = arith.constant dense<0.000000e+00> : vector<2x8x8xf32>
    %303 = tpu.matmul %302, %289, %cst_129 {dimension_numbers = #tpu.dot_dimension_numbers<[2], [1], [1], [2], [0, 0, 0, 1, 1, 2], [0], [0]>} : vector<2x8x8xf32>, vector<2x8x8xf32>, vector<2x8x8xf32> -> vector<2x8x8xf32>
    "tpu.trace_stop"() : () -> ()
    %304 = vector.shape_cast %303 : vector<2x8x8xf32> to vector<16x8xf32>
    %305 = vector.extract_strided_slice %197 {offsets = [24, 0], sizes = [8, 32], strides = [1, 1]} : vector<32x32xf32> to vector<8x32xf32>
    %cst_130 = arith.constant dense<0.000000e+00> : vector<16x32xf32>
    %306 = tpu.matmul %304, %305, %cst_130 {dimension_numbers = #tpu.dot_dimension_numbers<[1], [0], [0], [1], [0, 0, 1, 1], [], []>} : vector<16x8xf32>, vector<8x32xf32>, vector<16x32xf32> -> vector<16x32xf32>
    %307 = arith.addf %283, %306 : vector<16x32xf32>
    %308 = vector.broadcast %199 : vector<1x32xf32> to vector<16x32xf32>
    %309 = arith.addf %307, %308 : vector<16x32xf32>
    %310 = arith.addf %191, %309 : vector<16x32xf32>
    %c1_131 = arith.constant 1 : index
    %c0_132 = arith.constant 0 : index
    %c0_133 = arith.constant 0 : index
    %311 = vector.load %arg9[%c1_131, %c0_132, %c0_133] : memref<2x1x32xf32, #tpu.memory_space<vmem>>, vector<1x1x32xf32>
    %312 = vector.shape_cast %311 : vector<1x1x32xf32> to vector<1x32xf32>
    %c1_134 = arith.constant 1 : index
    %c0_135 = arith.constant 0 : index
    %c0_136 = arith.constant 0 : index
    %313 = vector.load %arg10[%c1_134, %c0_135, %c0_136] : memref<2x1x32xf32, #tpu.memory_space<vmem>>, vector<1x1x32xf32>
    %314 = vector.shape_cast %313 : vector<1x1x32xf32> to vector<1x32xf32>
    %cst_137 = arith.constant dense<0.000000e+00> : vector<16xf32>
    %315 = vector.multi_reduction <add>, %310, %cst_137 [1] : vector<16x32xf32> to vector<16xf32>
    %316 = vector.shape_cast %315 : vector<16xf32> to vector<16x1xf32>
    %cst_138 = arith.constant 3.200000e+01 : f32
    %317 = vector.broadcast %cst_138 : f32 to vector<16x1xf32>
    %318 = arith.divf %316, %317 : vector<16x1xf32>
    %319 = vector.broadcast %318 : vector<16x1xf32> to vector<16x32xf32>
    %320 = arith.subf %310, %319 : vector<16x32xf32>
    %321 = arith.mulf %320, %320 : vector<16x32xf32>
    %cst_139 = arith.constant dense<0.000000e+00> : vector<16xf32>
    %322 = vector.multi_reduction <add>, %321, %cst_139 [1] : vector<16x32xf32> to vector<16xf32>
    %323 = vector.shape_cast %322 : vector<16xf32> to vector<16x1xf32>
    %cst_140 = arith.constant 3.200000e+01 : f32
    %324 = vector.broadcast %cst_140 : f32 to vector<16x1xf32>
    %325 = arith.divf %323, %324 : vector<16x1xf32>
    %326 = vector.broadcast %318 : vector<16x1xf32> to vector<16x32xf32>
    %327 = arith.subf %310, %326 : vector<16x32xf32>
    %cst_141 = arith.constant 9.99999974E-6 : f32
    %328 = vector.broadcast %cst_141 : f32 to vector<16x1xf32>
    %329 = arith.addf %325, %328 : vector<16x1xf32>
    %330 = math.rsqrt %329 : vector<16x1xf32>
    %331 = vector.broadcast %330 : vector<16x1xf32> to vector<16x32xf32>
    %332 = arith.mulf %327, %331 : vector<16x32xf32>
    %333 = vector.broadcast %312 : vector<1x32xf32> to vector<16x32xf32>
    %334 = arith.mulf %332, %333 : vector<16x32xf32>
    %335 = vector.broadcast %314 : vector<1x32xf32> to vector<16x32xf32>
    %336 = arith.addf %334, %335 : vector<16x32xf32>
    %cst_142 = arith.constant dense<0.000000e+00> : vector<16x64xf32>
    %337 = tpu.matmul %336, %201, %cst_142 {dimension_numbers = #tpu.dot_dimension_numbers<[1], [0], [0], [1], [0, 0, 1, 1], [], []>} : vector<16x32xf32>, vector<32x64xf32>, vector<16x64xf32> -> vector<16x64xf32>
    %338 = vector.broadcast %203 : vector<1x64xf32> to vector<16x64xf32>
    %339 = arith.addf %337, %338 : vector<16x64xf32>
    %cst_143 = arith.constant 0.000000e+00 : f32
    %340 = vector.broadcast %cst_143 : f32 to vector<16x64xf32>
    %341 = arith.maximumf %339, %340 : vector<16x64xf32>
    %cst_144 = arith.constant dense<0.000000e+00> : vector<16x32xf32>
    %342 = tpu.matmul %341, %205, %cst_144 {dimension_numbers = #tpu.dot_dimension_numbers<[1], [0], [0], [1], [0, 0, 1, 1], [], []>} : vector<16x64xf32>, vector<64x32xf32>, vector<16x32xf32> -> vector<16x32xf32>
    %343 = vector.broadcast %207 : vector<1x32xf32> to vector<16x32xf32>
    %344 = arith.addf %342, %343 : vector<16x32xf32>
    %345 = arith.addf %336, %344 : vector<16x32xf32>
    %c1_145 = arith.constant 1 : index
    %c0_146 = arith.constant 0 : index
    %c0_147 = arith.constant 0 : index
    %346 = vector.load %arg15[%c1_145, %c0_146, %c0_147] : memref<2x1x32xf32, #tpu.memory_space<vmem>>, vector<1x1x32xf32>
    %347 = vector.shape_cast %346 : vector<1x1x32xf32> to vector<1x32xf32>
    %c1_148 = arith.constant 1 : index
    %c0_149 = arith.constant 0 : index
    %c0_150 = arith.constant 0 : index
    %348 = vector.load %arg16[%c1_148, %c0_149, %c0_150] : memref<2x1x32xf32, #tpu.memory_space<vmem>>, vector<1x1x32xf32>
    %349 = vector.shape_cast %348 : vector<1x1x32xf32> to vector<1x32xf32>
    %cst_151 = arith.constant dense<0.000000e+00> : vector<16xf32>
    %350 = vector.multi_reduction <add>, %345, %cst_151 [1] : vector<16x32xf32> to vector<16xf32>
    %351 = vector.shape_cast %350 : vector<16xf32> to vector<16x1xf32>
    %cst_152 = arith.constant 3.200000e+01 : f32
    %352 = vector.broadcast %cst_152 : f32 to vector<16x1xf32>
    %353 = arith.divf %351, %352 : vector<16x1xf32>
    %354 = vector.broadcast %353 : vector<16x1xf32> to vector<16x32xf32>
    %355 = arith.subf %345, %354 : vector<16x32xf32>
    %356 = arith.mulf %355, %355 : vector<16x32xf32>
    %cst_153 = arith.constant dense<0.000000e+00> : vector<16xf32>
    %357 = vector.multi_reduction <add>, %356, %cst_153 [1] : vector<16x32xf32> to vector<16xf32>
    %358 = vector.shape_cast %357 : vector<16xf32> to vector<16x1xf32>
    %cst_154 = arith.constant 3.200000e+01 : f32
    %359 = vector.broadcast %cst_154 : f32 to vector<16x1xf32>
    %360 = arith.divf %358, %359 : vector<16x1xf32>
    %361 = vector.broadcast %353 : vector<16x1xf32> to vector<16x32xf32>
    %362 = arith.subf %345, %361 : vector<16x32xf32>
    %cst_155 = arith.constant 9.99999974E-6 : f32
    %363 = vector.broadcast %cst_155 : f32 to vector<16x1xf32>
    %364 = arith.addf %360, %363 : vector<16x1xf32>
    %365 = math.rsqrt %364 : vector<16x1xf32>
    %366 = vector.broadcast %365 : vector<16x1xf32> to vector<16x32xf32>
    %367 = arith.mulf %362, %366 : vector<16x32xf32>
    %368 = vector.broadcast %347 : vector<1x32xf32> to vector<16x32xf32>
    %369 = arith.mulf %367, %368 : vector<16x32xf32>
    %370 = vector.broadcast %349 : vector<1x32xf32> to vector<16x32xf32>
    %371 = arith.addf %369, %370 : vector<16x32xf32>
    %c0_156 = arith.constant 0 : index
    %c0_157 = arith.constant 0 : index
    %372 = vector.load %arg17[%c0_156, %c0_157] : memref<16x32xf32, #tpu.memory_space<vmem>>, vector<16x32xf32>
    tpu.vector_store %arg17[%c0_156, %c0_157], %371 {strides = array<i32>} : memref<16x32xf32, #tpu.memory_space<vmem>>, vector<16x32xf32>,
    return
  }
  func.func @transform_0(%arg0: i32) -> (i32, i32) {
    %c0_i32 = arith.constant 0 : i32
    %c0_i32_0 = arith.constant 0 : i32
    %c0_i32_1 = arith.constant 0 : i32
    return %c0_i32, %c0_i32_0 : i32, i32
  }
  func.func @transform_1(%arg0: i32) -> (i32, i32) {
    %c0_i32 = arith.constant 0 : i32
    %c0_i32_0 = arith.constant 0 : i32
    %c0_i32_1 = arith.constant 0 : i32
    return %c0_i32, %c0_i32_0 : i32, i32
  }
  func.func @transform_2(%arg0: i32) -> (i32, i32) {
    %c0_i32 = arith.constant 0 : i32
    %c0_i32_0 = arith.constant 0 : i32
    %c0_i32_1 = arith.constant 0 : i32
    return %c0_i32, %c0_i32_0 : i32, i32
  }
  func.func @transform_3(%arg0: i32) -> (i32, i32) {
    %c0_i32 = arith.constant 0 : i32
    %c0_i32_0 = arith.constant 0 : i32
    %c0_i32_1 = arith.constant 0 : i32
    return %c0_i32, %c0_i32_0 : i32, i32
  }
  func.func @transform_4(%arg0: i32) -> (i32, i32, i32) {
    %c0_i32 = arith.constant 0 : i32
    %c0_i32_0 = arith.constant 0 : i32
    %c0_i32_1 = arith.constant 0 : i32
    %c0_i32_2 = arith.constant 0 : i32
    return %c0_i32, %c0_i32_0, %c0_i32_1 : i32, i32, i32
  }
  func.func @transform_5(%arg0: i32) -> (i32, i32, i32) {
    %c0_i32 = arith.constant 0 : i32
    %c0_i32_0 = arith.constant 0 : i32
    %c0_i32_1 = arith.constant 0 : i32
    %c0_i32_2 = arith.constant 0 : i32
    return %c0_i32, %c0_i32_0, %c0_i32_1 : i32, i32, i32
  }
  func.func @transform_6(%arg0: i32) -> (i32, i32, i32) {
    %c0_i32 = arith.constant 0 : i32
    %c0_i32_0 = arith.constant 0 : i32
    %c0_i32_1 = arith.constant 0 : i32
    %c0_i32_2 = arith.constant 0 : i32
    return %c0_i32, %c0_i32_0, %c0_i32_1 : i32, i32, i32
  }
  func.func @transform_7(%arg0: i32) -> (i32, i32, i32) {
    %c0_i32 = arith.constant 0 : i32
    %c0_i32_0 = arith.constant 0 : i32
    %c0_i32_1 = arith.constant 0 : i32
    %c0_i32_2 = arith.constant 0 : i32
    return %c0_i32, %c0_i32_0, %c0_i32_1 : i32, i32, i32
  }
  func.func @transform_8(%arg0: i32) -> (i32, i32, i32) {
    %c0_i32 = arith.constant 0 : i32
    %c0_i32_0 = arith.constant 0 : i32
    %c0_i32_1 = arith.constant 0 : i32
    %c0_i32_2 = arith.constant 0 : i32
    return %c0_i32, %c0_i32_0, %c0_i32_1 : i32, i32, i32
  }
  func.func @transform_9(%arg0: i32) -> (i32, i32, i32) {
    %c0_i32 = arith.constant 0 : i32
    %c0_i32_0 = arith.constant 0 : i32
    %c0_i32_1 = arith.constant 0 : i32
    %c0_i32_2 = arith.constant 0 : i32
    return %c0_i32, %c0_i32_0, %c0_i32_1 : i32, i32, i32
  }
  func.func @transform_10(%arg0: i32) -> (i32, i32, i32) {
    %c0_i32 = arith.constant 0 : i32
    %c0_i32_0 = arith.constant 0 : i32
    %c0_i32_1 = arith.constant 0 : i32
    %c0_i32_2 = arith.constant 0 : i32
    return %c0_i32, %c0_i32_0, %c0_i32_1 : i32, i32, i32
  }
  func.func @transform_11(%arg0: i32) -> (i32, i32, i32) {
    %c0_i32 = arith.constant 0 : i32
    %c0_i32_0 = arith.constant 0 : i32
    %c0_i32_1 = arith.constant 0 : i32
    %c0_i32_2 = arith.constant 0 : i32
    return %c0_i32, %c0_i32_0, %c0_i32_1 : i32, i32, i32
  }
  func.func @transform_12(%arg0: i32) -> (i32, i32, i32) {
    %c0_i32 = arith.constant 0 : i32
    %c0_i32_0 = arith.constant 0 : i32
    %c0_i32_1 = arith.constant 0 : i32
    %c0_i32_2 = arith.constant 0 : i32
    return %c0_i32, %c0_i32_0, %c0_i32_1 : i32, i32, i32
  }
  func.func @transform_13(%arg0: i32) -> (i32, i32, i32) {
    %c0_i32 = arith.constant 0 : i32
    %c0_i32_0 = arith.constant 0 : i32
    %c0_i32_1 = arith.constant 0 : i32
    %c0_i32_2 = arith.constant 0 : i32
    return %c0_i32, %c0_i32_0, %c0_i32_1 : i32, i32, i32
  }
  func.func @transform_14(%arg0: i32) -> (i32, i32, i32) {
    %c0_i32 = arith.constant 0 : i32
    %c0_i32_0 = arith.constant 0 : i32
    %c0_i32_1 = arith.constant 0 : i32
    %c0_i32_2 = arith.constant 0 : i32
    return %c0_i32, %c0_i32_0, %c0_i32_1 : i32, i32, i32
  }
  func.func @transform_15(%arg0: i32) -> (i32, i32, i32) {
    %c0_i32 = arith.constant 0 : i32
    %c0_i32_0 = arith.constant 0 : i32
    %c0_i32_1 = arith.constant 0 : i32
    %c0_i32_2 = arith.constant 0 : i32
    return %c0_i32, %c0_i32_0, %c0_i32_1 : i32, i32, i32
  }
  func.func @transform_16(%arg0: i32) -> (i32, i32) {
    %c0_i32 = arith.constant 0 : i32
    %c0_i32_0 = arith.constant 0 : i32
    %c0_i32_1 = arith.constant 0 : i32
    return %c0_i32, %c0_i32_0 : i32, i32
  }
}

</mosaic_0001>

<bundles_post_ra>
// kernel: tpu_custom_call.1
= control target key start
LH: loop header
LB: loop body
LE: loop exit
PB: predicated region body
PF: predicated region fallthrough
CT: control target
= control target key end

     0   :  { %s5686_s0 = inlined_call_operand.vmem [shape: f32[16,1], index: 0, kind: input, shape index: {}]   ;;  %s5687_s1 = inlined_call_operand.vmem [shape: f32[16,32], index: 1, kind: input, shape index: {}]   ;;  %s5688_s2 = inlined_call_operand.hbm [shape: f32[1,32], index: 2, kind: input, shape index: {}]   ;;  %s5689_s3 = inlined_call_operand.hbm [shape: f32[1,32], index: 3, kind: input, shape index: {}]   ;;  %s5690_s4 = inlined_call_operand.vmem [shape: f32[2,32,96], index: 4, kind: input, shape index: {}]   ;;  %s5691_s5 = inlined_call_operand.vmem [shape: f32[2,1,96], index: 5, kind: input, shape index: {}]   ;;  %s5692_s6 = inlined_call_operand.vmem [shape: f32[2,32,32], index: 6, kind: input, shape index: {}]   ;;  %s5693_s7 = inlined_call_operand.vmem [shape: f32[2,1,32], index: 7, kind: input, shape index: {}]   ;;  %s5694_s8 = inlined_call_operand.vmem [shape: f32[2,1,32], index: 8, kind: input, shape index: {}]   ;;  %s5695_s9 = inlined_call_operand.vmem [shape: f32[2,1,32], index: 9, kind: input, shape index: {}]   ;;  %s5696_s10 = inlined_call_operand.vmem [shape: f32[2,32,64], index: 10, kind: input, shape index: {}]   ;;  %s5697_s11 = inlined_call_operand.vmem [shape: f32[2,1,64], index: 11, kind: input, shape index: {}]   ;;  %s5698_s12 = inlined_call_operand.vmem [shape: f32[2,64,32], index: 12, kind: input, shape index: {}]   ;;  %s5699_s13 = inlined_call_operand.vmem [shape: f32[2,1,32], index: 13, kind: input, shape index: {}]   ;;  %s5700_s14 = inlined_call_operand.vmem [shape: f32[2,1,32], index: 14, kind: input, shape index: {}]   ;;  %s5701_s15 = inlined_call_operand.vmem [shape: f32[2,1,32], index: 15, kind: input, shape index: {}]   ;;  %s5702_s16 = inlined_call_operand.hbm [shape: f32[16,32], index: 16, kind: output, shape index: {}]  }
   0x1   :  { %5710 = sst [smem:[#allocation11_spill]] %s5686_s0 }
   0x2   :  { %21 = vsyncpa [#allocation3], 0 }
   0x3   :  { %22 = vsyncpa [#allocation6], 0 }
   0x4   :  { %23 = vsyncpa [#allocation4], 0  ;;  %s5016_s21 = smov [#allocation2]   ;;  %s5017_s23 = smov [#allocation5]  }
   0x5   :  { %s34_s22 = sshll.u32 %s5016_s21, 4  ;;  %s44_s24 = sshll.u32 %s5017_s23, 4  ;;  %s35_s22 = int_to_ptr.vmem [resolvable:$true] %s34_s22  ;;  %s45_s24 = int_to_ptr.vmem [resolvable:$true] %s44_s24 }
   0x6   :  { %s4944_s27 = scalar_lea.hbm %s5688_s2, 16 }
   0x7   :  { %p4945_p0 = scmp.ne.s32.totalorder %s5688_s2, %s4944_s27  ;;  %p4948_p1 = scmp.lt.u32.totalorder %s4944_s27, %s5688_s2 }
   0x9   :  { %p4950_p2 = pnand %p4948_p1, %p4945_p0 }
   0xb   :  { %4953 = shalt.err (!%p4950_p2)
}
   0xc   :  { %s4954_s17 = scalar_lea.vmem %s35_s22, 16  ;;  %s4958_s18 = scalar_lea.vmem %s35_s22, 32 }
   0xd   :  { %p4955_p3 = scmp.ne.s32.totalorder %s35_s22, %s4954_s17  ;;  %p4959_p4 = scmp.lt.s32.totalorder %s35_s22, %s35_s22 }
   0xe   :  { %p4960_p5 = scmp.lt.s32.totalorder %s4958_s18, %s4954_s17 }
  0x10   :  { %p4961_p6 = por %p4960_p5, %p4959_p4 }
  0x12   :  { %p4962_p7 = pnand %p4961_p6, %p4955_p3 }
  0x14   :  { %4965 = shalt.err (!%p4962_p7)
}
  0x15   :  { %37 = dma.hbm_to_vmem [thread:$0]  %s5688_s2, 16, %s35_s22, [#allocation3]  }
  0x16   :  { %s4966_s25 = scalar_lea.hbm %s5689_s3, 16 }
  0x17   :  { %p4967_p8 = scmp.ne.s32.totalorder %s5689_s3, %s4966_s25  ;;  %p4970_p9 = scmp.lt.u32.totalorder %s4966_s25, %s5689_s3 }
  0x19   :  { %p4972_p10 = pnand %p4970_p9, %p4967_p8 }
  0x1b   :  { %4975 = shalt.err (!%p4972_p10)
}
  0x1c   :  { %s4976_s30 = scalar_lea.vmem %s45_s24, 16  ;;  %s4980_s0 = scalar_lea.vmem %s45_s24, 32 }
  0x1d   :  { %p4977_p11 = scmp.ne.s32.totalorder %s45_s24, %s4976_s30  ;;  %p4981_p12 = scmp.lt.s32.totalorder %s45_s24, %s45_s24 }
  0x1e   :  { %p4982_p13 = scmp.lt.s32.totalorder %s4980_s0, %s4976_s30 }
  0x20   :  { %p4983_p0 = por %p4982_p13, %p4981_p12 }
  0x22   :  { %p4984_p1 = pnand %p4983_p0, %p4977_p11 }
  0x24   :  { %4987 = shalt.err (!%p4984_p1)
}
  0x25   :  { %47 = dma.hbm_to_vmem [thread:$0]  %s5689_s3, 16, %s45_s24, [#allocation6]  }
  0x26   :  { %5010 = dma.done.wait [#allocation3], 16  }
  0x27   :  { %5011 = vsyncadd [#allocation3], 4294967280 }
  0x28   :  { %5012 = dma.done.wait [#allocation6], 16  }
  0x29   :  { %5013 = vsyncadd [#allocation6], 4294967280  ;;  %v5018_v0 = vmov 0   ;;  %s5711_s19 = sld [smem:[#allocation11_spill]]  ;;  %v114_v3 = vld [vmem:[%s5690_s4] sm:$0xff]  ;;  %v115_v4 = vld [vmem:[%s5690_s4 + $0x8] sm:$0xff] }
  0x2a   :  { %4863 = vset.pattern.permute.xlu0 %v5018_v0  ;;  %v4768_v5 = vpack.c.bf16 %v115_v4, %v114_v3  ;;  %v116_v6 = vld [vmem:[%s5690_s4 + $0x10] sm:$0xff]  ;;  %v117_v7 = vld [vmem:[%s5690_s4 + $0x18] sm:$0xff]  ;;  %v4232_v9 = vld [vmem:[#allocation2] ss:$0 sm:$0xff]  ;;  %vm144_vm0 = vcmask 261120   ;;  %v5019_v23 = vmov 0.0  }
  0x2b   :  { %v4772_v8 = vpack.c.bf16 %v117_v7, %v116_v6  ;;  %v4233_v10 = vld [vmem:[#allocation5] ss:$0 sm:$0xff]  ;;  %v111_v20 = vld [vmem:[%s5687_s1 + $0x8] sm:$0xff]  ;;  %4507 = vmatprep.subr.mxu0 %v5019_v23  ;;  %vm5020_vm1 = vmmov 0   ;;  %v4234_v24 = vld [vmem:[%s5691_s5] ss:$0 sm:$0xff] }
  0x2c   :  { %4769 = vmatprep.subr.bf16.mxu1 %v4768_v5  ;;  %v110_v15 = vld [vmem:[%s5687_s1] sm:$0xff]  ;;  %4509 = vmatprep.mubr.msk.f32.mxu0 %vm5020_vm1, %v5019_v23  ;;  %s5021_s18 = smov 96   ;;  %vm229_vm2 = vcmask 64512   ;;  %s5023_s20 = smov 120   ;;  %vm2031_vm3 = vcmask 523264  }
  0x2d   :  { %4771 = vmatpush3.bf16.msra.mxu1 %v4768_v5  ;;  %s5024_s21 = smov 88   ;;  %s5025_s23 = smov 80  }
  0x2e   :  { %4773 = vmatprep.subr.bf16.mxu1 %v4772_v8  ;;  %s5026_s25 = smov 56   ;;  %s5027_s3 = smov 112  }
  0x2f   :  { %v78_v1 = vld [vmem:[%s5711_s19] sm:$0xff]  ;;  %v79_v2 = vld [vmem:[%s5711_s19 + $0x8] sm:$0xff]  ;;  %s5022_s19 = smov 64   ;;  %s5028_s24 = smov 48  }
  0x30   :  { %83 = vperm.xlu0 %4863, %v78_v1   ;;  %s5708_s26 = smov 72   ;;  %s5706_s27 = smov 104  }
  0x31   :  { %4775 = vmatpush3.bf16.msra.mxu1 %v4772_v8  ;;  %s5704_s1 = smov 40   ;;  %s5032_s28 = smov [#allocation7]  }
  0x32   :  { %4497 = vmatprep.subr.mxu1 %v5019_v23 }
  0x34   :  { %88 = vperm.xlu0 %4863, %v79_v2  }
  0xaf   :  { %v84_v11 = vpop.permute.xlu0 %83 }
  0xb0   :  { %v97_v12 = vmul.f32 %v4232_v9, %v84_v11 }
  0xb2   :  { %v106_v13 = vadd.f32 %v4233_v10, %v97_v12 }
  0xb3   :  { %v89_v14 = vpop.permute.xlu0 %88 }
  0xb4   :  { %v108_v16 = vmul.f32 5.656854, %v106_v13  ;;  %v98_v17 = vmul.f32 %v4232_v9, %v89_v14 }
  0xb6   :  { %v107_v18 = vadd.f32 %v4233_v10, %v98_v17  ;;  %v5165_v19 = vadd.f32 %v110_v15, %v108_v16 }
  0xb8   :  { %v109_v21 = vmul.f32 5.656854, %v107_v18  ;;  %4494 = vmatprep.mubr.msk.f32.mxu1 %vm144_vm0, %v5165_v19 }
  0xba   :  { %v5172_v22 = vadd.f32 %v111_v20, %v109_v21 }
  0xbc   :  { %4495 = vmatmul.mubr.msk.f32.vlgmr.msra.gmra.mrb[0].mxu1 %vm144_vm0, %v5172_v22 }
  0xbd   :  { %4499 = vmatprep.mubr.msk.f32.mxu1 %vm5020_vm1, %v5019_v23 }
 0x18f   :  { %v4496_v25 = vpop.f32.mrb[0].mxu1 }
 0x190   :  { %v217_v26 = vpop.f32.mrb[1].mxu1  ;;  %v5189_v28 = vadd.f32 %v4496_v25, %v4234_v24 }
 0x191   :  { %v5185_v27 = vadd.f32 %v4234_v24, %v217_v26 }
 0x193   :  { %227 = vrot.lane.b32.xlu1 %v5185_v27, %s5021_s18 }
 0x197   :  { %305 = vrot.lane.b32.xlu1 %v5189_v28, %s5021_s18 }
 0x205   :  { %v228_v29 = vpop.permute.xlu1 %227 }
 0x206   :  { %4498 = vmatpush3.xpose.msk.msra.mxu1 %vm229_vm2, %v228_v29 }
 0x207   :  { %4502 = vmatprep.subr.mxu1 %v5019_v23 }
 0x209   :  { %4500 = vmatmul.mubr.msk.f32.vlgmr.msra.gmra.mrb[2].mxu1 %vm229_vm2, %v5185_v27  ;;  %v306_v30 = vpop.permute.xlu1 %305 }
 0x20a   :  { %4503 = vmatpush3.xpose.msk.msra.mxu1 %vm229_vm2, %v306_v30  ;;  %4504 = vmatprep.mubr.msk.f32.mxu1 %vm5020_vm1, %v5019_v23 }
 0x20b   :  { %4512 = vmatprep.subr.mxu1 %v5019_v23 }
 0x20d   :  { %4505 = vmatmul.mubr.msk.f32.vlgmr.msra.gmra.mrb[4].mxu1 %vm229_vm2, %v5189_v28 }
 0x20e   :  { %4514 = vmatprep.mubr.msk.f32.mxu1 %vm5020_vm1, %v5019_v23 }
 0x2dc   :  { %v300_v31 = vpop.f32.mrb[2].mxu1 }
 0x2dd   :  { %v4501_v32 = vpop.f32.mrb[3].mxu1  ;;  %v381_v43 = vmul.f32 0.35355338, %v300_v31 }
 0x2df   :  { %v383_v44 = vsel %vm229_vm2, %v381_v43, -inf }
 0x2e0   :  { %v377_v33 = vpop.f32.mrb[4].mxu1 }
 0x2e1   :  { %v382_v34 = vmul.f32 0.35355338, %v377_v33  ;;  %v4506_v35 = vpop.f32.mrb[5].mxu1 }
 0x2e3   :  { %v386_v36 = vsel %vm229_vm2, %v382_v34, -inf }
 0x2e4   :  { %387 = vmax.xlane.f32.xlu0 %v386_v36 }
 0x2fa   :  { %481 = vrot.lane.b32.xlu0 %v5189_v28, %s5022_s19 }
 0x2fe   :  { %635 = vrot.lane.b32.xlu0 %v5189_v28, %s5023_s20 }
 0x371   :  { %v388_v37 = vpop.xlane.xlu0 %387 }
 0x372   :  { %v390_v38 = vsub.f32 %v382_v34, %v388_v37 }
 0x374   :  { %v393_v39 = vmul.f32 1.442695, %v390_v38 }
 0x375   :  { %v482_v40 = vpop.permute.xlu0 %481 }
 0x376   :  { %4864 = vpow2.f32 %v393_v39  ;;  %4513 = vmatpush3.msra.mxu1 %v482_v40 }
 0x377   :  { %4522 = vmatprep.subr.mxu1 %v5019_v23 }
 0x379   :  { %v636_v49 = vpop.permute.xlu0 %635 }
 0x380   :  { %v4865_v41 = vpop.eup %4864 }
 0x381   :  { %v398_v42 = vsel %vm229_vm2, %v4865_v41, 0.0 }
 0x382   :  { %399 = vadd.xlane.f32.xlu1 %v398_v42 }
 0x393   :  { %637 = vrot.lane.b32.xlu1 %v5189_v28, %s5024_s21 }
 0x3b7   :  { %384 = vmax.xlane.f32.xlu1 %v383_v44 }
 0x3c8   :  { %559 = vrot.lane.b32.xlu1 %v5185_v27, %s5024_s21 }
 0x3cc   :  { %557 = vrot.lane.b32.xlu1 %v5185_v27, %s5023_s20 }
 0x3d0   :  { %1053 = vrot.lane.b32.xlu1 %v5185_v27, %s5025_s23 }
 0x40f   :  { %v400_v45 = vpop.xlane.xlu1 %399 }
 0x410   :  { %4866 = vrcp.f32 %v400_v45 }
 0x413   :  { %v638_v48 = vpop.permute.xlu1 %637 }
 0x41a   :  { %v4867_v46 = vpop.eup %4866 }
 0x41b   :  { %v404_v47 = vmul.f32 %v4867_v46, %v4865_v41 }
 0x41d   :  { %4515 = vmatmul.mubr.msk.f32.vlgmr.msra.gmra.mrb[6].mxu1 %vm229_vm2, %v404_v47  ;;  %v120_v47 = vld [vmem:[%s5692_s6 + $0x8] sm:$0xff] }
 0x41e   :  { %4523 = vmatpush3.xpose.msk.msra.mxu1 %vm229_vm2, %v638_v48  ;;  %4524 = vmatprep.mubr.msk.f32.mxu1 %vm5020_vm1, %v5019_v23  ;;  %v119_v48 = vld [vmem:[%s5692_s6] sm:$0xff] }
 0x41f   :  { %4532 = vmatprep.subr.mxu1 %v5019_v23 }
 0x421   :  { %4525 = vmatmul.mubr.msk.f32.vlgmr.msra.gmra.mrb[8].mxu1 %vm229_vm2, %v636_v49 }
 0x422   :  { %4534 = vmatprep.mubr.msk.f32.mxu1 %vm5020_vm1, %v5019_v23 }
 0x444   :  { %v385_v50 = vpop.xlane.xlu1 %384 }
 0x445   :  { %v389_v51 = vsub.f32 %v381_v43, %v385_v50 }
 0x447   :  { %v391_v52 = vmul.f32 1.442695, %v389_v51 }
 0x448   :  { %v560_v58 = vpop.permute.xlu1 %559 }
 0x449   :  { %4868 = vpow2.f32 %v391_v52 }
 0x44c   :  { %v558_v62 = vpop.permute.xlu1 %557 }
 0x450   :  { %v1054_v15 = vpop.permute.xlu1 %1053 }
 0x453   :  { %v4869_v53 = vpop.eup %4868 }
 0x454   :  { %v395_v54 = vsel %vm229_vm2, %v4869_v53, 0.0 }
 0x455   :  { %396 = vadd.xlane.f32.xlu0 %v395_v54 }
 0x46b   :  { %405 = vrot.lane.b32.xlu0 %v5185_v27, %s5022_s19 }
 0x4e2   :  { %v397_v55 = vpop.xlane.xlu0 %396 }
 0x4e3   :  { %4870 = vrcp.f32 %v397_v55 }
 0x4e6   :  { %v406_v56 = vpop.permute.xlu0 %405 }
 0x4e7   :  { %4508 = vmatpush3.msra.mxu0 %v406_v56 }
 0x4e8   :  { %4517 = vmatprep.subr.mxu0 %v5019_v23 }
 0x4ed   :  { %v4871_v57 = vpop.eup %4870 }
 0x4ee   :  { %v403_v59 = vmul.f32 %v4871_v57, %v4869_v53 }
 0x4f0   :  { %4510 = vmatmul.mubr.msk.f32.vlgmr.msra.gmra.mrb[0].mxu0 %vm229_vm2, %v403_v59  ;;  %v5234_v60 = vpop.f32.mrb[6].mxu1 }
 0x4f1   :  { %4518 = vmatpush3.xpose.msk.msra.mxu0 %vm229_vm2, %v560_v58  ;;  %v4516_v61 = vpop.f32.mrb[7].mxu1  ;;  %4519 = vmatprep.mubr.msk.f32.mxu0 %vm5020_vm1, %v5019_v23 }
 0x4f2   :  { %4527 = vmatprep.subr.mxu0 %v5019_v23 }
 0x4f4   :  { %4520 = vmatmul.mubr.msk.f32.vlgmr.msra.gmra.mrb[2].mxu0 %vm229_vm2, %v558_v62  ;;  %v709_v63 = vpop.f32.mrb[8].mxu1 }
 0x4f5   :  { %v714_v0 = vmul.f32 0.35355338, %v709_v63  ;;  %v4526_v1 = vpop.f32.mrb[9].mxu1  ;;  %4529 = vmatprep.mubr.msk.f32.mxu0 %vm5020_vm1, %v5019_v23 }
 0x4f7   :  { %v718_v2 = vsel %vm229_vm2, %v714_v0, -inf }
 0x4f8   :  { %719 = vmax.xlane.f32.xlu0 %v718_v2 }
 0x50e   :  { %813 = vrot.lane.b32.xlu0 %v5189_v28, %s5026_s25 }
 0x512   :  { %1051 = vrot.lane.b32.xlu0 %v5185_v27, %s5027_s3 }
 0x516   :  { %1129 = vrot.lane.b32.xlu0 %v5189_v28, %s5027_s3 }
 0x585   :  { %v720_v3 = vpop.xlane.xlu0 %719 }
 0x586   :  { %v722_v4 = vsub.f32 %v714_v0, %v720_v3  ;;  %v121_v0 = vld [vmem:[%s5692_s6 + $0x10] sm:$0xff] }
 0x588   :  { %v725_v5 = vmul.f32 1.442695, %v722_v4 }
 0x589   :  { %v814_v6 = vpop.permute.xlu0 %813 }
 0x58a   :  { %4872 = vpow2.f32 %v725_v5  ;;  %4533 = vmatpush3.msra.mxu1 %v814_v6 }
 0x58b   :  { %4547 = vmatprep.subr.mxu1 %v5019_v23 }
 0x58d   :  { %v1052_v20 = vpop.permute.xlu0 %1051 }
 0x591   :  { %v1130_v24 = vpop.permute.xlu0 %1129 }
 0x594   :  { %v4873_v7 = vpop.eup %4872 }
 0x595   :  { %v730_v8 = vsel %vm229_vm2, %v4873_v7, 0.0 }
 0x596   :  { %731 = vadd.xlane.f32.xlu1 %v730_v8 }
 0x5a7   :  { %1131 = vrot.lane.b32.xlu1 %v5189_v28, %s5025_s23 }
 0x5c3   :  { %v5254_v9 = vpop.f32.mrb[0].mxu0 }
 0x5c4   :  { %v4511_v10 = vpop.f32.mrb[1].mxu0 }
 0x5c7   :  { %v631_v11 = vpop.f32.mrb[2].mxu0 }
 0x5c8   :  { %v713_v12 = vmul.f32 0.35355338, %v631_v11  ;;  %v4521_v13 = vpop.f32.mrb[3].mxu0 }
 0x5ca   :  { %v715_v14 = vsel %vm229_vm2, %v713_v12, -inf }
 0x5cb   :  { %716 = vmax.xlane.f32.xlu1 %v715_v14 }
 0x623   :  { %v732_v16 = vpop.xlane.xlu1 %731 }
 0x624   :  { %4874 = vrcp.f32 %v732_v16 }
 0x627   :  { %v1132_v21 = vpop.permute.xlu1 %1131 }
 0x62e   :  { %v4875_v17 = vpop.eup %4874 }
 0x62f   :  { %v736_v18 = vmul.f32 %v4875_v17, %v4873_v7 }
 0x631   :  { %4535 = vmatmul.mubr.msk.f32.vlgmr.msra.gmra.mrb[10].mxu1 %vm229_vm2, %v736_v18 }
 0x632   :  { %4548 = vmatpush3.xpose.msk.msra.mxu1 %vm229_vm2, %v1054_v15  ;;  %4549 = vmatprep.mubr.msk.f32.mxu1 %vm5020_vm1, %v5019_v23 }
 0x633   :  { %4552 = vmatprep.subr.mxu1 %v5019_v23 }
 0x635   :  { %4550 = vmatmul.mubr.msk.f32.vlgmr.msra.gmra.mrb[12].mxu1 %vm229_vm2, %v1052_v20 }
 0x636   :  { %4553 = vmatpush3.xpose.msk.msra.mxu1 %vm229_vm2, %v1132_v21  ;;  %4554 = vmatprep.mubr.msk.f32.mxu1 %vm5020_vm1, %v5019_v23 }
 0x637   :  { %4562 = vmatprep.subr.mxu1 %v5019_v23 }
 0x639   :  { %4555 = vmatmul.mubr.msk.f32.vlgmr.msra.gmra.mrb[14].mxu1 %vm229_vm2, %v1130_v24 }
 0x63a   :  { %4564 = vmatprep.mubr.msk.f32.mxu1 %vm5020_vm1, %v5019_v23 }
 0x658   :  { %v717_v25 = vpop.xlane.xlu1 %716 }
 0x659   :  { %v721_v26 = vsub.f32 %v713_v12, %v717_v25 }
 0x65b   :  { %v723_v29 = vmul.f32 1.442695, %v721_v26 }
 0x65d   :  { %4876 = vpow2.f32 %v723_v29 }
 0x667   :  { %v4877_v30 = vpop.eup %4876 }
 0x668   :  { %v727_v31 = vsel %vm229_vm2, %v4877_v30, 0.0 }
 0x669   :  { %728 = vadd.xlane.f32.xlu0 %v727_v31 }
 0x67f   :  { %737 = vrot.lane.b32.xlu0 %v5185_v27, %s5026_s25 }
 0x683   :  { %1307 = vrot.lane.b32.xlu0 %v5189_v28, %s5028_s24 }
 0x687   :  { %1468 = vrot.lane.b32.xlu0 %v5185_v27, %s5708_s26 }
 0x68b   :  { %1546 = vrot.lane.b32.xlu0 %v5189_v28, %s5708_s26 }
 0x68f   :  { %1466 = vrot.lane.b32.xlu0 %v5185_v27, %s5706_s27 }
 0x6f6   :  { %v729_v32 = vpop.xlane.xlu0 %728 }
 0x6f7   :  { %4878 = vrcp.f32 %v729_v32 }
 0x6fa   :  { %v738_v33 = vpop.permute.xlu0 %737 }
 0x6fb   :  { %4528 = vmatpush3.msra.mxu0 %v738_v33 }
 0x6fc   :  { %4537 = vmatprep.subr.mxu0 %v120_v47 }
 0x6fe   :  { %v1308_v34 = vpop.permute.xlu0 %1307 }
 0x6ff   :  { %4563 = vmatpush3.msra.mxu1 %v1308_v34 }
 0x700   :  { %4572 = vmatprep.subr.mxu1 %v5019_v23 }
 0x701   :  { %v4879_v35 = vpop.eup %4878 }
 0x702   :  { %v735_v36 = vmul.f32 %v4879_v35, %v4877_v30  ;;  %v1469_v2 = vpop.permute.xlu0 %1468 }
 0x704   :  { %4530 = vmatmul.mubr.msk.f32.vlgmr.msra.gmra.mrb[4].mxu0 %vm229_vm2, %v735_v36  ;;  %v885_v37 = vpop.f32.mrb[10].mxu1 }
 0x705   :  { %v4536_v38 = vpop.f32.mrb[11].mxu1  ;;  %4538 = vmatpush3.msra.mxu0 %v120_v47  ;;  %v4269_v47 = vld [vmem:[%s5693_s7] ss:$0 sm:$0xff] }
 0x706   :  { %4542 = vmatprep.subr.mxu0 %v119_v48  ;;  %v1547_v5 = vpop.permute.xlu0 %1546 }
 0x708   :  { %v1125_v39 = vpop.f32.mrb[12].mxu1 }
 0x709   :  { %v1207_v40 = vmul.f32 0.35355338, %v1125_v39  ;;  %v4551_v41 = vpop.f32.mrb[13].mxu1 }
 0x70a   :  { %v1467_v7 = vpop.permute.xlu0 %1466 }
 0x70b   :  { %v1209_v42 = vsel %vm229_vm2, %v1207_v40, -inf }
 0x70c   :  { %1210 = vmax.xlane.f32.xlu1 %v1209_v42  ;;  %v1203_v43 = vpop.f32.mrb[14].mxu1 }
 0x70d   :  { %v1208_v44 = vmul.f32 0.35355338, %v1203_v43  ;;  %v4556_v45 = vpop.f32.mrb[15].mxu1 }
 0x70f   :  { %v1212_v46 = vsel %vm229_vm2, %v1208_v44, -inf }
 0x710   :  { %1213 = vmax.xlane.f32.xlu1 %v1212_v46 }
 0x799   :  { %v1211_v49 = vpop.xlane.xlu1 %1210 }
 0x79a   :  { %v1215_v50 = vsub.f32 %v1207_v40, %v1211_v49  ;;  %v122_v40 = vld [vmem:[%s5692_s6 + $0x18] sm:$0xff] }
 0x79c   :  { %v1217_v51 = vmul.f32 1.442695, %v1215_v50 }
 0x79d   :  { %v1214_v52 = vpop.xlane.xlu1 %1213 }
 0x79e   :  { %4880 = vpow2.f32 %v1217_v51  ;;  %v1216_v53 = vsub.f32 %v1208_v44, %v1214_v52 }
 0x7a0   :  { %v1219_v54 = vmul.f32 1.442695, %v1216_v53 }
 0x7a2   :  { %4882 = vpow2.f32 %v1219_v54 }
 0x7a8   :  { %v4881_v55 = vpop.eup %4880 }
 0x7a9   :  { %v1221_v56 = vsel %vm229_vm2, %v4881_v55, 0.0 }
 0x7aa   :  { %1222 = vadd.xlane.f32.xlu1 %v1221_v56 }
 0x7ac   :  { %v4883_v57 = vpop.eup %4882 }
 0x7ad   :  { %v1224_v58 = vsel %vm229_vm2, %v4883_v57, 0.0 }
 0x7ae   :  { %1225 = vadd.xlane.f32.xlu1 %v1224_v58 }
 0x7bf   :  { %1231 = vrot.lane.b32.xlu1 %v5185_v27, %s5028_s24 }
 0x7c3   :  { %1544 = vrot.lane.b32.xlu1 %v5189_v28, %s5706_s27 }
 0x7d7   :  { %v809_v59 = vpop.f32.mrb[4].mxu0 }
 0x7d8   :  { %v4531_v61 = vpop.f32.mrb[5].mxu0  ;;  %4539 = vmatprep.mubr.msk.f32.mxu0 %vm229_vm2, %v809_v59 }
 0x7d9   :  { %4540 = vmatmul.mubr.msk.f32.vlgmr.msra.gmra.mrb[6].mxu0 %vm229_vm2, %v885_v37 }
 0x7da   :  { %4544 = vmatprep.mubr.msk.f32.mxu0 %vm229_vm2, %v5254_v9  ;;  %4543 = vmatpush3.msra.mxu0 %v119_v48 }
 0x7db   :  { %4557 = vmatprep.subr.mxu0 %v5019_v23 }
 0x7e1   :  { %4545 = vmatmul.mubr.msk.f32.vlgmr.msra.gmra.mrb[6].mxu0 %vm229_vm2, %v5234_v60 }
 0x7e2   :  { %4559 = vmatprep.mubr.msk.f32.mxu0 %vm5020_vm1, %v5019_v23 }
 0x837   :  { %v1223_v62 = vpop.xlane.xlu1 %1222 }
 0x838   :  { %4884 = vrcp.f32 %v1223_v62 }
 0x83b   :  { %v1226_v63 = vpop.xlane.xlu1 %1225 }
 0x83c   :  { %4886 = vrcp.f32 %v1226_v63 }
 0x83f   :  { %v1232_v1 = vpop.permute.xlu1 %1231 }
 0x840   :  { %4558 = vmatpush3.msra.mxu0 %v1232_v1 }
 0x841   :  { %4567 = vmatprep.subr.mxu0 %v121_v0 }
 0x842   :  { %v4885_v3 = vpop.eup %4884 }
 0x843   :  { %v1229_v4 = vmul.f32 %v4885_v3, %v4881_v55  ;;  %v1545_v12 = vpop.permute.xlu1 %1544 }
 0x845   :  { %4560 = vmatmul.mubr.msk.f32.vlgmr.msra.gmra.mrb[8].mxu0 %vm229_vm2, %v1229_v4  ;;  %v126_v4 = vld [vmem:[%s5696_s10 + $0x10] sm:$0xff] }
 0x846   :  { %v4887_v60 = vpop.eup %4886  ;;  %4568 = vmatpush3.msra.mxu0 %v121_v0 }
 0x847   :  { %v1230_v6 = vmul.f32 %v4887_v60, %v4883_v57  ;;  %4577 = vmatprep.subr.mxu0 %v5019_v23  ;;  %v127_v60 = vld [vmem:[%s5696_s10 + $0x18] sm:$0xff] }
 0x849   :  { %4565 = vmatmul.mubr.msk.f32.vlgmr.msra.gmra.mrb[16].mxu1 %vm229_vm2, %v1230_v6  ;;  %v129_v6 = vld [vmem:[%s5698_s12] sm:$0xff] }
 0x84a   :  { %4573 = vmatpush3.xpose.msk.msra.mxu1 %vm229_vm2, %v1469_v2  ;;  %4574 = vmatprep.mubr.msk.f32.mxu1 %vm5020_vm1, %v5019_v23  ;;  %v125_v2 = vld [vmem:[%s5696_s10 + $0x8] sm:$0xff] }
 0x84b   :  { %4582 = vmatprep.subr.mxu1 %v5019_v23 }
 0x84d   :  { %4575 = vmatmul.mubr.msk.f32.vlgmr.msra.gmra.mrb[18].mxu1 %vm229_vm2, %v1467_v7  ;;  %v130_v7 = vld [vmem:[%s5698_s12 + $0x8] sm:$0xff] }
 0x84e   :  { %4584 = vmatprep.mubr.msk.f32.mxu1 %vm5020_vm1, %v5019_v23 }
 0x918   :  { %v1303_v8 = vpop.f32.mrb[8].mxu0 }
 0x919   :  { %v4561_v9 = vpop.f32.mrb[9].mxu0  ;;  %4569 = vmatprep.mubr.msk.f32.mxu0 %vm229_vm2, %v1303_v8  ;;  %v131_v8 = vld [vmem:[%s5698_s12 + $0x10] sm:$0xff] }
 0x91a   :  { %v4784_v9 = vpack.c.bf16 %v130_v7, %v129_v6 }
 0x91c   :  { %v1379_v10 = vpop.f32.mrb[16].mxu1 }
 0x91d   :  { %v4566_v11 = vpop.f32.mrb[17].mxu1  ;;  %4570 = vmatmul.mubr.msk.f32.vlgmr.msra.gmra.mrb[6].mxu0 %vm229_vm2, %v1379_v10  ;;  %v132_v10 = vld [vmem:[%s5698_s12 + $0x18] sm:$0xff] }
 0x91e   :  { %4578 = vmatpush3.xpose.msk.msra.mxu0 %vm229_vm2, %v1547_v5  ;;  %4579 = vmatprep.mubr.msk.f32.mxu0 %vm5020_vm1, %v5019_v23  ;;  %v4780_v5 = vpack.c.bf16 %v127_v60, %v126_v4  ;;  %v4788_v11 = vpack.c.bf16 %v132_v10, %v131_v8  ;;  %v4278_v10 = vld [vmem:[%s5700_s14] ss:$0 sm:$0xff] }
 0x91f   :  { %4587 = vmatprep.subr.mxu0 %v5019_v23 }
 0x920   :  { %v1540_v13 = vpop.f32.mrb[18].mxu1 }
 0x921   :  { %v1622_v14 = vmul.f32 0.35355338, %v1540_v13  ;;  %v4576_v15 = vpop.f32.mrb[19].mxu1  ;;  %4580 = vmatmul.mubr.msk.f32.vlgmr.msra.gmra.mrb[10].mxu0 %vm229_vm2, %v1545_v12  ;;  %v133_v12 = vld [vmem:[%s5698_s12 + $0x20] sm:$0xff]  ;;  %v134_v13 = vld [vmem:[%s5698_s12 + $0x28] sm:$0xff] }
 0x922   :  { %4589 = vmatprep.mubr.msk.f32.mxu0 %vm5020_vm1, %v5019_v23 }
 0x923   :  { %v1624_v16 = vsel %vm229_vm2, %v1622_v14, -inf }
 0x924   :  { %1625 = vmax.xlane.f32.xlu0 %v1624_v16 }
 0x9b1   :  { %v1626_v17 = vpop.xlane.xlu0 %1625 }
 0x9b2   :  { %v1630_v18 = vsub.f32 %v1622_v14, %v1626_v17  ;;  %v4792_v14 = vpack.c.bf16 %v134_v13, %v133_v12 }
 0x9b4   :  { %v1632_v20 = vmul.f32 1.442695, %v1630_v18 }
 0x9b6   :  { %4888 = vpow2.f32 %v1632_v20 }
 0x9c0   :  { %v4889_v21 = vpop.eup %4888 }
 0x9c1   :  { %v1636_v24 = vsel %vm229_vm2, %v4889_v21, 0.0 }
 0x9c2   :  { %1637 = vadd.xlane.f32.xlu0 %v1636_v24 }
 0x9f4   :  { %v1618_v25 = vpop.f32.mrb[10].mxu0 }
 0x9f5   :  { %v1623_v26 = vmul.f32 0.35355338, %v1618_v25  ;;  %v4581_v29 = vpop.f32.mrb[11].mxu0  ;;  %v4270_v25 = vld [vmem:[%s5694_s8] ss:$0 sm:$0xff] }
 0x9f7   :  { %v1627_v30 = vsel %vm229_vm2, %v1623_v26, -inf }
 0x9f8   :  { %1628 = vmax.xlane.f32.xlu1 %v1627_v30 }
 0xa09   :  { %1646 = vrot.lane.b32.xlu1 %v5185_v27, %s5704_s1 }
 0xa4f   :  { %v1638_v31 = vpop.xlane.xlu0 %1637 }
 0xa50   :  { %4890 = vrcp.f32 %v1638_v31  ;;  %v4271_v31 = vld [vmem:[%s5695_s9] ss:$0 sm:$0xff] }
 0xa5a   :  { %v4891_v33 = vpop.eup %4890 }
 0xa5b   :  { %v1644_v36 = vmul.f32 %v4891_v33, %v4889_v21 }
 0xa85   :  { %v1629_v32 = vpop.xlane.xlu1 %1628 }
 0xa86   :  { %v1631_v34 = vsub.f32 %v1623_v26, %v1629_v32 }
 0xa88   :  { %v1634_v35 = vmul.f32 1.442695, %v1631_v34 }
 0xa89   :  { %v1647_v37 = vpop.permute.xlu1 %1646 }
 0xa8a   :  { %4892 = vpow2.f32 %v1634_v35  ;;  %4583 = vmatpush3.msra.mxu1 %v1647_v37  ;;  %v136_v37 = vld [vmem:[%s5698_s12 + $0x38] sm:$0xff] }
 0xa8b   :  { %4585 = vmatmul.mubr.msk.f32.vlgmr.msra.gmra.mrb[20].mxu1 %vm229_vm2, %v1644_v36  ;;  %v135_v36 = vld [vmem:[%s5698_s12 + $0x30] sm:$0xff] }
 0xa94   :  { %v4893_v38 = vpop.eup %4892 }
 0xa95   :  { %v1639_v39 = vsel %vm229_vm2, %v4893_v38, 0.0 }
 0xa96   :  { %1640 = vadd.xlane.f32.xlu0 %v1639_v39  ;;  %v4272_v39 = vld [vmem:[%s5697_s11] ss:$0 sm:$0xff] }
 0xaac   :  { %1722 = vrot.lane.b32.xlu0 %v5189_v28, %s5704_s1 }
 0xb23   :  { %v1641_v27 = vpop.xlane.xlu0 %1640 }
 0xb24   :  { %4894 = vrcp.f32 %v1641_v27 }
 0xb27   :  { %v1723_v41 = vpop.permute.xlu0 %1722 }
 0xb28   :  { %4588 = vmatpush3.msra.mxu0 %v1723_v41 }
 0xb29   :  { %4592 = vmatprep.subr.mxu0 %v122_v40 }
 0xb2e   :  { %v4895_v42 = vpop.eup %4894 }
 0xb2f   :  { %v1645_v43 = vmul.f32 %v4895_v42, %v4893_v38  ;;  %v4796_v38 = vpack.c.bf16 %v136_v37, %v135_v36 }
 0xb31   :  { %4590 = vmatmul.mubr.msk.f32.vlgmr.msra.gmra.mrb[12].mxu0 %vm229_vm2, %v1645_v43 }
 0xb32   :  { %4593 = vmatpush3.msra.mxu0 %v122_v40 }
 0xb33   :  { %4785 = vmatprep.subr.bf16.mxu0 %v4784_v9 }
 0xb5e   :  { %v1718_v44 = vpop.f32.mrb[20].mxu1 }
 0xb5f   :  { %v4586_v45 = vpop.f32.mrb[21].mxu1  ;;  %4594 = vmatprep.mubr.msk.f32.mxu0 %vm229_vm2, %v1718_v44 }
 0xb60   :  { %v4275_v45 = vld [vmem:[%s5699_s13] ss:$0 sm:$0xff] }
 0xc04   :  { %v1794_v46 = vpop.f32.mrb[12].mxu0 }
 0xc05   :  { %v4591_v28 = vpop.f32.mrb[13].mxu0  ;;  %4595 = vmatmul.mubr.msk.f32.vlgmr.msra.gmra.mrb[6].mxu0 %vm229_vm2, %v1794_v46 }
 0xc06   :  { %4787 = vmatpush3.bf16.msra.mxu0 %v4784_v9 }
 0xc07   :  { %4789 = vmatprep.subr.bf16.mxu0 %v4788_v11 }
 0xc0a   :  { %4791 = vmatpush3.bf16.msra.mxu0 %v4788_v11 }
 0xc0b   :  { %4793 = vmatprep.subr.bf16.mxu0 %v4792_v14 }
 0xc0e   :  { %4795 = vmatpush3.bf16.msra.mxu0 %v4792_v14  ;;  %v4279_v14 = vld [vmem:[%s5701_s15] ss:$0 sm:$0xff] }
 0xc0f   :  { %4797 = vmatprep.subr.bf16.mxu0 %v4796_v38 }
 0xc12   :  { %4799 = vmatpush3.bf16.msra.mxu0 %v4796_v38 }
 0xc13   :  { %4648 = vmatprep.subr.mxu0 %v5019_v23 }
 0xcd8   :  { %v4596_v48 = vpop.f32.mrb[6].mxu0 }
 0xcd9   :  { %v1888_v49 = vadd.f32 %v4596_v48, %v4269_v47  ;;  %v1870_v50 = vpop.f32.mrb[7].mxu0 }
 0xcda   :  { %v1887_v51 = vadd.f32 %v4269_v47, %v1870_v50 }
 0xcdb   :  { %v1890_v52 = vadd.f32 %v1888_v49, %v5172_v22 }
 0xcdc   :  { %v1889_v53 = vadd.f32 %v1887_v51, %v5165_v19  ;;  %v124_v19 = vld [vmem:[%s5696_s10] sm:$0xff] }
 0xcdd   :  { %v1896_v54 = vsel %vm144_vm0, %v1890_v52, 0.0  ;;  %v4776_v3 = vpack.c.bf16 %v125_v2, %v124_v19  ;;  %v4282_v19 = vld [vmem:[%s5690_s4 + $0x30] sm:$0xff]  ;;  %v4283_v2 = vld [vmem:[%s5690_s4 + $0x38] sm:$0xff] }
 0xcde   :  { %1897 = vadd.xlane.f32.xlu0 %v1896_v54  ;;  %v1893_v55 = vsel %vm144_vm0, %v1889_v53, 0.0 }
 0xcdf   :  { %1894 = vadd.xlane.f32.xlu1 %v1893_v55  ;;  %4777 = vmatprep.subr.bf16.mxu1 %v4776_v3 }
 0xce0   :  { %4779 = vmatpush3.bf16.msra.mxu1 %v4776_v3  ;;  %v4804_v3 = vpack.c.bf16 %v4283_v2, %v4282_v19 }
 0xce1   :  { %4781 = vmatprep.subr.bf16.mxu1 %v4780_v5 }
 0xce4   :  { %4783 = vmatpush3.bf16.msra.mxu1 %v4780_v5 }
 0xd6b   :  { %v1898_v56 = vpop.xlane.xlu0 %1897 }
 0xd6c   :  { %v1901_v57 = vmul.f32 0.03125, %v1898_v56  ;;  %v1895_v58 = vpop.xlane.xlu1 %1894 }
 0xd6d   :  { %v1900_v59 = vmul.f32 0.03125, %v1895_v58 }
 0xd6e   :  { %v1903_v61 = vsub.f32 %v1890_v52, %v1901_v57 }
 0xd6f   :  { %v1902_v62 = vsub.f32 %v1889_v53, %v1900_v59 }
 0xd70   :  { %v1905_v63 = vmul.f32 %v1903_v61, %v1903_v61 }
 0xd71   :  { %v1904_v0 = vmul.f32 %v1902_v62, %v1902_v62 }
 0xd72   :  { %v1909_v1 = vsel %vm144_vm0, %v1905_v63, 0.0 }
 0xd73   :  { %1910 = vadd.xlane.f32.xlu0 %v1909_v1  ;;  %v1906_v22 = vsel %vm144_vm0, %v1904_v0, 0.0  ;;  %v4280_v0 = vld [vmem:[%s5690_s4 + $0x20] sm:$0xff]  ;;  %v4281_v1 = vld [vmem:[%s5690_s4 + $0x28] sm:$0xff] }
 0xd74   :  { %1907 = vadd.xlane.f32.xlu1 %v1906_v22  ;;  %v4800_v22 = vpack.c.bf16 %v4281_v1, %v4280_v0 }
 0xd76   :  { %4801 = vmatprep.subr.bf16.mxu1 %v4800_v22 }
 0xe00   :  { %v1911_v15 = vpop.xlane.xlu0 %1910 }
 0xe01   :  { %v1913_v16 = vmul.f32 0.03125, %v1911_v15  ;;  %v1908_v17 = vpop.xlane.xlu1 %1907 }
 0xe02   :  { %v1912_v18 = vmul.f32 0.03125, %v1908_v17 }
 0xe03   :  { %v1915_v20 = vadd.f32 1e-05, %v1913_v16 }
 0xe04   :  { %v1914_v21 = vadd.f32 1e-05, %v1912_v18 }
 0xe05   :  { %4896 = vrsqrt.f32 %v1915_v20  ;;  %v4304_v20 = vld [vmem:[%s5691_s5 + $0x1] ss:$0 sm:$0xff]  ;;  %s5712_s5 = smov 72  }
 0xe06   :  { %4898 = vrsqrt.f32 %v1914_v21 }
 0xe0f   :  { %v4897_v24 = vpop.eup %4896 }
 0xe10   :  { %v4899_v26 = vpop.eup %4898  ;;  %v1919_v29 = vmul.f32 %v4897_v24, %v1903_v61 }
 0xe11   :  { %v1918_v30 = vmul.f32 %v4899_v26, %v1902_v62 }
 0xe12   :  { %v1927_v32 = vmul.f32 %v4270_v25, %v1919_v29 }
 0xe13   :  { %v1926_v33 = vmul.f32 %v4270_v25, %v1918_v30 }
 0xe14   :  { %v1935_v35 = vadd.f32 %v4271_v31, %v1927_v32 }
 0xe15   :  { %v1934_v34 = vadd.f32 %v4271_v31, %v1926_v33 }
 0xe17   :  { %4605 = vmatprep.mubr.msk.f32.mxu1 %vm144_vm0, %v1934_v34 }
 0xe18   :  { %4606 = vmatmul.mubr.msk.f32.vlgmr.msra.gmra.mrb[22].mxu1 %vm144_vm0, %v1935_v35 }
 0xe19   :  { %4803 = vmatpush3.bf16.msra.mxu1 %v4800_v22 }
 0xe1a   :  { %4805 = vmatprep.subr.bf16.mxu1 %v4804_v3 }
 0xe1d   :  { %4807 = vmatpush3.bf16.msra.mxu1 %v4804_v3 }
 0xe1e   :  { %4638 = vmatprep.subr.mxu1 %v5019_v23 }
 0xeeb   :  { %v4607_v27 = vpop.f32.mrb[22].mxu1 }
 0xeec   :  { %v2020_v40 = vadd.f32 %v4607_v27, %v4272_v39  ;;  %v2014_v41 = vpop.f32.mrb[23].mxu1 }
 0xeed   :  { %v2015_v42 = vadd.f32 %v4272_v39, %v2014_v41 }
 0xeee   :  { %v2024_v44 = vmax.f32 %v2020_v40, 0.0 }
 0xeef   :  { %v2023_v43 = vmax.f32 %v2015_v42, 0.0 }
 0xef1   :  { %4624 = vmatprep.mubr.msk.f32.mxu0 %vm2031_vm3, %v2023_v43 }
 0xef2   :  { %4625 = vmatmul.mubr.msk.f32.vlgmr.msra.gmra.mrb[14].mxu0 %vm2031_vm3, %v2024_v44 }
 0xef3   :  { %4650 = vmatprep.mubr.msk.f32.mxu0 %vm5020_vm1, %v5019_v23 }
 0xfc5   :  { %v4626_v46 = vpop.f32.mrb[14].mxu0 }
 0xfc6   :  { %v2110_v28 = vadd.f32 %v4626_v46, %v4275_v45  ;;  %v2104_v47 = vpop.f32.mrb[15].mxu0 }
 0xfc7   :  { %v2105_v48 = vadd.f32 %v4275_v45, %v2104_v47 }
 0xfc8   :  { %v2114_v49 = vadd.f32 %v2110_v28, %v1935_v35 }
 0xfc9   :  { %v2113_v50 = vadd.f32 %v2105_v48, %v1934_v34 }
 0xfca   :  { %v2120_v51 = vsel %vm144_vm0, %v2114_v49, 0.0 }
 0xfcb   :  { %2121 = vadd.xlane.f32.xlu0 %v2120_v51  ;;  %v2117_v52 = vsel %vm144_vm0, %v2113_v50, 0.0 }
 0xfcc   :  { %2118 = vadd.xlane.f32.xlu1 %v2117_v52 }
0x1058   :  { %v2122_v53 = vpop.xlane.xlu0 %2121 }
0x1059   :  { %v2124_v54 = vmul.f32 0.03125, %v2122_v53  ;;  %v2119_v55 = vpop.xlane.xlu1 %2118 }
0x105a   :  { %v2123_v56 = vmul.f32 0.03125, %v2119_v55 }
0x105b   :  { %v2126_v57 = vsub.f32 %v2114_v49, %v2124_v54 }
0x105c   :  { %v2125_v58 = vsub.f32 %v2113_v50, %v2123_v56 }
0x105d   :  { %v2128_v59 = vmul.f32 %v2126_v57, %v2126_v57 }
0x105e   :  { %v2127_v61 = vmul.f32 %v2125_v58, %v2125_v58 }
0x105f   :  { %v2132_v62 = vsel %vm144_vm0, %v2128_v59, 0.0 }
0x1060   :  { %2133 = vadd.xlane.f32.xlu0 %v2132_v62  ;;  %v2129_v63 = vsel %vm144_vm0, %v2127_v61, 0.0 }
0x1061   :  { %2130 = vadd.xlane.f32.xlu1 %v2129_v63 }
0x10ed   :  { %v2134_v4 = vpop.xlane.xlu0 %2133 }
0x10ee   :  { %v2136_v60 = vmul.f32 0.03125, %v2134_v4  ;;  %v2131_v5 = vpop.xlane.xlu1 %2130 }
0x10ef   :  { %v2135_v6 = vmul.f32 0.03125, %v2131_v5 }
0x10f0   :  { %v2138_v7 = vadd.f32 1e-05, %v2136_v60 }
0x10f1   :  { %v2137_v8 = vadd.f32 1e-05, %v2135_v6 }
0x10f2   :  { %4900 = vrsqrt.f32 %v2138_v7 }
0x10f3   :  { %4902 = vrsqrt.f32 %v2137_v8 }
0x10fc   :  { %v4901_v9 = vpop.eup %4900 }
0x10fd   :  { %v4903_v11 = vpop.eup %4902  ;;  %v2142_v12 = vmul.f32 %v4901_v9, %v2126_v57 }
0x10fe   :  { %v2141_v13 = vmul.f32 %v4903_v11, %v2125_v58 }
0x10ff   :  { %v2150_v15 = vmul.f32 %v4278_v10, %v2142_v12 }
0x1100   :  { %v2149_v16 = vmul.f32 %v4278_v10, %v2141_v13 }
0x1101   :  { %v5432_v18 = vadd.f32 %v4279_v14, %v2150_v15 }
0x1102   :  { %v5430_v17 = vadd.f32 %v4279_v14, %v2149_v16 }
0x1104   :  { %4635 = vmatprep.mubr.msk.f32.mxu1 %vm144_vm0, %v5430_v17 }
0x1105   :  { %4636 = vmatmul.mubr.msk.f32.vlgmr.msra.gmra.mrb[24].mxu1 %vm144_vm0, %v5432_v18 }
0x1106   :  { %4640 = vmatprep.mubr.msk.f32.mxu1 %vm5020_vm1, %v5019_v23 }
0x11d8   :  { %v4637_v21 = vpop.f32.mrb[24].mxu1 }
0x11d9   :  { %v5443_v24 = vadd.f32 %v4637_v21, %v4304_v20  ;;  %v2269_v25 = vpop.f32.mrb[25].mxu1 }
0x11da   :  { %v5445_v26 = vadd.f32 %v4304_v20, %v2269_v25 }
0x11db   :  { %2356 = vrot.lane.b32.xlu0 %v5443_v24, %s5021_s18 }
0x11dc   :  { %2279 = vrot.lane.b32.xlu1 %v5445_v26, %s5021_s18  ;;  %s5713_s18 = smov 104  }
0x124d   :  { %v2357_v30 = vpop.permute.xlu0 %2356 }
0x124e   :  { %v2280_v29 = vpop.permute.xlu1 %2279 }
0x124f   :  { %4639 = vmatpush3.xpose.msk.msra.mxu1 %vm229_vm2, %v2280_v29 }
0x1250   :  { %4643 = vmatprep.subr.mxu1 %v5019_v23 }
0x1252   :  { %4641 = vmatmul.mubr.msk.f32.vlgmr.msra.gmra.mrb[26].mxu1 %vm229_vm2, %v5445_v26 }
0x1253   :  { %4644 = vmatpush3.xpose.msk.msra.mxu1 %vm229_vm2, %v2357_v30  ;;  %4645 = vmatprep.mubr.msk.f32.mxu1 %vm5020_vm1, %v5019_v23 }
0x1254   :  { %4653 = vmatprep.subr.mxu1 %v5019_v23 }
0x1256   :  { %4646 = vmatmul.mubr.msk.f32.vlgmr.msra.gmra.mrb[28].mxu1 %vm229_vm2, %v5443_v24 }
0x1257   :  { %4655 = vmatprep.mubr.msk.f32.mxu1 %vm5020_vm1, %v5019_v23 }
0x1325   :  { %v2351_v31 = vpop.f32.mrb[26].mxu1 }
0x1326   :  { %v4642_v32 = vpop.f32.mrb[27].mxu1  ;;  %v2432_v37 = vmul.f32 0.35355338, %v2351_v31 }
0x1328   :  { %v2434_v38 = vsel %vm229_vm2, %v2432_v37, -inf }
0x1329   :  { %v2428_v33 = vpop.f32.mrb[28].mxu1 }
0x132a   :  { %v2433_v34 = vmul.f32 0.35355338, %v2428_v33  ;;  %v4647_v35 = vpop.f32.mrb[29].mxu1 }
0x132c   :  { %v2437_v36 = vsel %vm229_vm2, %v2433_v34, -inf }
0x132d   :  { %2438 = vmax.xlane.f32.xlu1 %v2437_v36 }
0x133e   :  { %2532 = vrot.lane.b32.xlu1 %v5443_v24, %s5022_s19 }
0x1342   :  { %2686 = vrot.lane.b32.xlu1 %v5443_v24, %s5023_s20 }
0x1366   :  { %2435 = vmax.xlane.f32.xlu1 %v2434_v38 }
0x1377   :  { %2610 = vrot.lane.b32.xlu1 %v5445_v26, %s5024_s21 }
0x137b   :  { %2608 = vrot.lane.b32.xlu1 %v5445_v26, %s5023_s20 }
0x137f   :  { %3104 = vrot.lane.b32.xlu1 %v5445_v26, %s5025_s23 }
0x13ba   :  { %v2439_v39 = vpop.xlane.xlu1 %2438 }
0x13bb   :  { %v2441_v27 = vsub.f32 %v2433_v34, %v2439_v39 }
0x13bd   :  { %v2444_v40 = vmul.f32 1.442695, %v2441_v27 }
0x13be   :  { %v2533_v41 = vpop.permute.xlu1 %2532 }
0x13bf   :  { %4904 = vpow2.f32 %v2444_v40  ;;  %4654 = vmatpush3.msra.mxu1 %v2533_v41 }
0x13c0   :  { %4663 = vmatprep.subr.mxu1 %v5019_v23 }
0x13c2   :  { %v2687_v44 = vpop.permute.xlu1 %2686 }
0x13c9   :  { %v4905_v42 = vpop.eup %4904 }
0x13ca   :  { %v2449_v43 = vsel %vm229_vm2, %v4905_v42, 0.0 }
0x13cb   :  { %2450 = vadd.xlane.f32.xlu0 %v2449_v43 }
0x13e1   :  { %2688 = vrot.lane.b32.xlu0 %v5443_v24, %s5024_s21 }
0x13f3   :  { %v2436_v45 = vpop.xlane.xlu1 %2435 }
0x13f4   :  { %v2440_v46 = vsub.f32 %v2432_v37, %v2436_v45 }
0x13f6   :  { %v2442_v28 = vmul.f32 1.442695, %v2440_v46  ;;  %v4286_v46 = vld [vmem:[%s5692_s6 + $0x28] sm:$0xff] }
0x13f7   :  { %v2611_v56 = vpop.permute.xlu1 %2610 }
0x13f8   :  { %4906 = vpow2.f32 %v2442_v28  ;;  %v4285_v28 = vld [vmem:[%s5692_s6 + $0x20] sm:$0xff] }
0x13fb   :  { %v2609_v58 = vpop.permute.xlu1 %2608 }
0x13ff   :  { %v3105_v11 = vpop.permute.xlu1 %3104 }
0x1402   :  { %v4907_v47 = vpop.eup %4906 }
0x1403   :  { %v2446_v48 = vsel %vm229_vm2, %v4907_v47, 0.0 }
0x1404   :  { %2447 = vadd.xlane.f32.xlu0 %v2446_v48 }
0x141a   :  { %2456 = vrot.lane.b32.xlu0 %v5445_v26, %s5022_s19 }
0x1458   :  { %v2451_v49 = vpop.xlane.xlu0 %2450 }
0x1459   :  { %4908 = vrcp.f32 %v2451_v49 }
0x145c   :  { %v2689_v52 = vpop.permute.xlu0 %2688 }
0x1463   :  { %v4909_v50 = vpop.eup %4908 }
0x1464   :  { %v2455_v51 = vmul.f32 %v4909_v50, %v4905_v42 }
0x1466   :  { %4656 = vmatmul.mubr.msk.f32.vlgmr.msra.gmra.mrb[30].mxu1 %vm229_vm2, %v2455_v51 }
0x1467   :  { %4664 = vmatpush3.xpose.msk.msra.mxu1 %vm229_vm2, %v2689_v52  ;;  %4665 = vmatprep.mubr.msk.f32.mxu1 %vm5020_vm1, %v5019_v23 }
0x1468   :  { %4673 = vmatprep.subr.mxu1 %v5019_v23 }
0x146a   :  { %4666 = vmatmul.mubr.msk.f32.vlgmr.msra.gmra.mrb[32].mxu1 %vm229_vm2, %v2687_v44 }
0x146b   :  { %4675 = vmatprep.mubr.msk.f32.mxu1 %vm5020_vm1, %v5019_v23 }
0x1491   :  { %v2448_v53 = vpop.xlane.xlu0 %2447 }
0x1492   :  { %4910 = vrcp.f32 %v2448_v53 }
0x1495   :  { %v2457_v54 = vpop.permute.xlu0 %2456 }
0x1496   :  { %4649 = vmatpush3.msra.mxu0 %v2457_v54 }
0x1497   :  { %4658 = vmatprep.subr.mxu0 %v5019_v23 }
0x149c   :  { %v4911_v55 = vpop.eup %4910 }
0x149d   :  { %v2454_v57 = vmul.f32 %v4911_v55, %v4907_v47 }
0x149f   :  { %4651 = vmatmul.mubr.msk.f32.vlgmr.msra.gmra.mrb[16].mxu0 %vm229_vm2, %v2454_v57 }
0x14a0   :  { %4659 = vmatpush3.xpose.msk.msra.mxu0 %vm229_vm2, %v2611_v56  ;;  %4660 = vmatprep.mubr.msk.f32.mxu0 %vm5020_vm1, %v5019_v23 }
0x14a1   :  { %4668 = vmatprep.subr.mxu0 %v5019_v23 }
0x14a3   :  { %4661 = vmatmul.mubr.msk.f32.vlgmr.msra.gmra.mrb[18].mxu0 %vm229_vm2, %v2609_v58 }
0x14a4   :  { %4670 = vmatprep.mubr.msk.f32.mxu0 %vm5020_vm1, %v5019_v23 }
0x1539   :  { %v5499_v59 = vpop.f32.mrb[30].mxu1 }
0x153a   :  { %v4657_v61 = vpop.f32.mrb[31].mxu1 }
0x153d   :  { %v2760_v62 = vpop.f32.mrb[32].mxu1 }
0x153e   :  { %v2765_v63 = vmul.f32 0.35355338, %v2760_v62  ;;  %v4667_v0 = vpop.f32.mrb[33].mxu1 }
0x1540   :  { %v2769_v1 = vsel %vm229_vm2, %v2765_v63, -inf }
0x1541   :  { %2770 = vmax.xlane.f32.xlu0 %v2769_v1 }
0x1557   :  { %2864 = vrot.lane.b32.xlu0 %v5443_v24, %s5026_s25 }
0x155b   :  { %3102 = vrot.lane.b32.xlu0 %v5445_v26, %s5027_s3 }
0x155f   :  { %3180 = vrot.lane.b32.xlu0 %v5443_v24, %s5027_s3 }
0x1572   :  { %v5508_v22 = vpop.f32.mrb[16].mxu0 }
0x1573   :  { %v4652_v19 = vpop.f32.mrb[17].mxu0 }
0x1576   :  { %v2682_v2 = vpop.f32.mrb[18].mxu0 }
0x1577   :  { %v4662_v3 = vpop.f32.mrb[19].mxu0  ;;  %v2764_v9 = vmul.f32 0.35355338, %v2682_v2 }
0x1579   :  { %v2766_v10 = vsel %vm229_vm2, %v2764_v9, -inf }
0x15ce   :  { %v2771_v4 = vpop.xlane.xlu0 %2770 }
0x15cf   :  { %v2773_v60 = vsub.f32 %v2765_v63, %v2771_v4  ;;  %v4287_v63 = vld [vmem:[%s5692_s6 + $0x30] sm:$0xff] }
0x15d1   :  { %v2776_v5 = vmul.f32 1.442695, %v2773_v60 }
0x15d2   :  { %v2865_v6 = vpop.permute.xlu0 %2864 }
0x15d3   :  { %4912 = vpow2.f32 %v2776_v5  ;;  %4674 = vmatpush3.msra.mxu1 %v2865_v6 }
0x15d4   :  { %4688 = vmatprep.subr.mxu1 %v5019_v23 }
0x15d6   :  { %v3103_v15 = vpop.permute.xlu0 %3102 }
0x15da   :  { %v3181_v20 = vpop.permute.xlu0 %3180 }
0x15dd   :  { %v4913_v7 = vpop.eup %4912 }
0x15de   :  { %v2781_v8 = vsel %vm229_vm2, %v4913_v7, 0.0 }
0x15df   :  { %2782 = vadd.xlane.f32.xlu1 %v2781_v8 }
0x15f0   :  { %3182 = vrot.lane.b32.xlu1 %v5443_v24, %s5025_s23 }
0x1614   :  { %2767 = vmax.xlane.f32.xlu1 %v2766_v10 }
0x166c   :  { %v2783_v12 = vpop.xlane.xlu1 %2782 }
0x166d   :  { %4914 = vrcp.f32 %v2783_v12 }
0x1670   :  { %v3183_v16 = vpop.permute.xlu1 %3182 }
0x1677   :  { %v4915_v13 = vpop.eup %4914 }
0x1678   :  { %v2787_v14 = vmul.f32 %v4915_v13, %v4913_v7 }
0x167a   :  { %4676 = vmatmul.mubr.msk.f32.vlgmr.msra.gmra.mrb[34].mxu1 %vm229_vm2, %v2787_v14 }
0x167b   :  { %4689 = vmatpush3.xpose.msk.msra.mxu1 %vm229_vm2, %v3105_v11  ;;  %4690 = vmatprep.mubr.msk.f32.mxu1 %vm5020_vm1, %v5019_v23 }
0x167c   :  { %4693 = vmatprep.subr.mxu1 %v5019_v23 }
0x167e   :  { %4691 = vmatmul.mubr.msk.f32.vlgmr.msra.gmra.mrb[36].mxu1 %vm229_vm2, %v3103_v15 }
0x167f   :  { %4694 = vmatpush3.xpose.msk.msra.mxu1 %vm229_vm2, %v3183_v16  ;;  %4695 = vmatprep.mubr.msk.f32.mxu1 %vm5020_vm1, %v5019_v23 }
0x1680   :  { %4703 = vmatprep.subr.mxu1 %v5019_v23 }
0x1682   :  { %4696 = vmatmul.mubr.msk.f32.vlgmr.msra.gmra.mrb[38].mxu1 %vm229_vm2, %v3181_v20 }
0x1683   :  { %4705 = vmatprep.mubr.msk.f32.mxu1 %vm5020_vm1, %v5019_v23 }
0x16a1   :  { %v2768_v21 = vpop.xlane.xlu1 %2767 }
0x16a2   :  { %v2772_v25 = vsub.f32 %v2764_v9, %v2768_v21 }
0x16a4   :  { %v2774_v29 = vmul.f32 1.442695, %v2772_v25 }
0x16a6   :  { %4916 = vpow2.f32 %v2774_v29 }
0x16b0   :  { %v4917_v30 = vpop.eup %4916 }
0x16b1   :  { %v2778_v31 = vsel %vm229_vm2, %v4917_v30, 0.0 }
0x16b2   :  { %2779 = vadd.xlane.f32.xlu0 %v2778_v31 }
0x16c8   :  { %2788 = vrot.lane.b32.xlu0 %v5445_v26, %s5026_s25 }
0x16cc   :  { %3358 = vrot.lane.b32.xlu0 %v5443_v24, %s5028_s24 }
0x16d0   :  { %3519 = vrot.lane.b32.xlu0 %v5445_v26, %s5712_s5 }
0x16d4   :  { %3597 = vrot.lane.b32.xlu0 %v5443_v24, %s5712_s5  ;;  %s4219_s5 = sshll.u32 %s5032_s28, 4  ;;  %s4220_s5 = int_to_ptr.vmem [resolvable:$true] %s4219_s5 }
0x16d5   :  { %p4993_p3 = scmp.lt.s32.totalorder %s4220_s5, %s4220_s5 }
0x16d8   :  { %3517 = vrot.lane.b32.xlu0 %v5445_v26, %s5713_s18 }
0x173f   :  { %v2780_v32 = vpop.xlane.xlu0 %2779 }
0x1740   :  { %4918 = vrcp.f32 %v2780_v32 }
0x1743   :  { %v2789_v33 = vpop.permute.xlu0 %2788 }
0x1744   :  { %4669 = vmatpush3.msra.mxu0 %v2789_v33 }
0x1745   :  { %4678 = vmatprep.subr.mxu0 %v4286_v46 }
0x1747   :  { %v3359_v34 = vpop.permute.xlu0 %3358 }
0x1748   :  { %4704 = vmatpush3.msra.mxu1 %v3359_v34 }
0x1749   :  { %4713 = vmatprep.subr.mxu1 %v5019_v23 }
0x174a   :  { %v4919_v35 = vpop.eup %4918 }
0x174b   :  { %v2786_v36 = vmul.f32 %v4919_v35, %v4917_v30  ;;  %v3520_v1 = vpop.permute.xlu0 %3519 }
0x174d   :  { %4671 = vmatmul.mubr.msk.f32.vlgmr.msra.gmra.mrb[20].mxu0 %vm229_vm2, %v2786_v36  ;;  %v2936_v37 = vpop.f32.mrb[34].mxu1 }
0x174e   :  { %v4677_v38 = vpop.f32.mrb[35].mxu1  ;;  %4679 = vmatpush3.msra.mxu0 %v4286_v46 }
0x174f   :  { %4683 = vmatprep.subr.mxu0 %v4285_v28  ;;  %v3598_v2 = vpop.permute.xlu0 %3597 }
0x1751   :  { %v3176_v39 = vpop.f32.mrb[36].mxu1 }
0x1752   :  { %v3258_v27 = vmul.f32 0.35355338, %v3176_v39  ;;  %v4692_v40 = vpop.f32.mrb[37].mxu1  ;;  %v4288_v39 = vld [vmem:[%s5692_s6 + $0x38] sm:$0xff] }
0x1753   :  { %v3518_v4 = vpop.permute.xlu0 %3517 }
0x1754   :  { %v3260_v41 = vsel %vm229_vm2, %v3258_v27, -inf }
0x1755   :  { %3261 = vmax.xlane.f32.xlu1 %v3260_v41  ;;  %v3254_v42 = vpop.f32.mrb[38].mxu1 }
0x1756   :  { %v3259_v43 = vmul.f32 0.35355338, %v3254_v42  ;;  %v4697_v44 = vpop.f32.mrb[39].mxu1 }
0x1758   :  { %v3263_v45 = vsel %vm229_vm2, %v3259_v43, -inf }
0x1759   :  { %3264 = vmax.xlane.f32.xlu1 %v3263_v45  ;;  %v4339_v45 = vld [vmem:[%s5693_s7 + $0x1] ss:$0 sm:$0xff] }
0x17e2   :  { %v3262_v47 = vpop.xlane.xlu1 %3261 }
0x17e3   :  { %v3266_v48 = vsub.f32 %v3258_v27, %v3262_v47 }
0x17e5   :  { %v3268_v49 = vmul.f32 1.442695, %v3266_v48 }
0x17e6   :  { %v3265_v50 = vpop.xlane.xlu1 %3264 }
0x17e7   :  { %4920 = vpow2.f32 %v3268_v49  ;;  %v3267_v51 = vsub.f32 %v3259_v43, %v3265_v50 }
0x17e9   :  { %v3270_v52 = vmul.f32 1.442695, %v3267_v51 }
0x17eb   :  { %4922 = vpow2.f32 %v3270_v52 }
0x17f1   :  { %v4921_v53 = vpop.eup %4920 }
0x17f2   :  { %v3272_v54 = vsel %vm229_vm2, %v4921_v53, 0.0 }
0x17f3   :  { %3273 = vadd.xlane.f32.xlu1 %v3272_v54 }
0x17f5   :  { %v4923_v55 = vpop.eup %4922 }
0x17f6   :  { %v3275_v56 = vsel %vm229_vm2, %v4923_v55, 0.0 }
0x17f7   :  { %3276 = vadd.xlane.f32.xlu1 %v3275_v56 }
0x1808   :  { %3282 = vrot.lane.b32.xlu1 %v5445_v26, %s5028_s24  ;;  %s5714_s24 = smov 40  }
0x180c   :  { %3595 = vrot.lane.b32.xlu1 %v5443_v24, %s5713_s18  ;;  %s4988_s18 = scalar_lea.vmem %s4220_s5, 256 }
0x180d   :  { %p4989_p2 = scmp.ne.s32.totalorder %s4220_s5, %s4988_s18  ;;  %p4994_p4 = scmp.lt.s32.totalorder %s4988_s18, %s4988_s18 }
0x180f   :  { %p4995_p5 = por %p4994_p4, %p4993_p3 }
0x1811   :  { %p4996_p6 = pnand %p4995_p5, %p4989_p2 }
0x1820   :  { %v2860_v57 = vpop.f32.mrb[20].mxu0 }
0x1821   :  { %v4672_v58 = vpop.f32.mrb[21].mxu0  ;;  %4680 = vmatprep.mubr.msk.f32.mxu0 %vm229_vm2, %v2860_v57 }
0x1822   :  { %4681 = vmatmul.mubr.msk.f32.vlgmr.msra.gmra.mrb[22].mxu0 %vm229_vm2, %v2936_v37 }
0x1823   :  { %4685 = vmatprep.mubr.msk.f32.mxu0 %vm229_vm2, %v5508_v22  ;;  %4684 = vmatpush3.msra.mxu0 %v4285_v28 }
0x1824   :  { %4698 = vmatprep.subr.mxu0 %v5019_v23 }
0x182a   :  { %4686 = vmatmul.mubr.msk.f32.vlgmr.msra.gmra.mrb[22].mxu0 %vm229_vm2, %v5499_v59 }
0x182b   :  { %4700 = vmatprep.mubr.msk.f32.mxu0 %vm5020_vm1, %v5019_v23 }
0x1880   :  { %v3274_v61 = vpop.xlane.xlu1 %3273 }
0x1881   :  { %4924 = vrcp.f32 %v3274_v61 }
0x1884   :  { %v3277_v62 = vpop.xlane.xlu1 %3276 }
0x1885   :  { %4926 = vrcp.f32 %v3277_v62 }
0x1888   :  { %v3283_v0 = vpop.permute.xlu1 %3282 }
0x1889   :  { %4699 = vmatpush3.msra.mxu0 %v3283_v0  ;;  %v4291_v0 = vld [vmem:[%s5696_s10 + $0x28] sm:$0xff] }
0x188a   :  { %4708 = vmatprep.subr.mxu0 %v4287_v63 }
0x188b   :  { %v4925_v22 = vpop.eup %4924 }
0x188c   :  { %v3280_v19 = vmul.f32 %v4925_v22, %v4921_v53  ;;  %v3596_v8 = vpop.permute.xlu1 %3595  ;;  %v4292_v22 = vld [vmem:[%s5696_s10 + $0x30] sm:$0xff] }
0x188e   :  { %4701 = vmatmul.mubr.msk.f32.vlgmr.msra.gmra.mrb[24].mxu0 %vm229_vm2, %v3280_v19  ;;  %v4293_v19 = vld [vmem:[%s5696_s10 + $0x38] sm:$0xff] }
0x188f   :  { %v4927_v59 = vpop.eup %4926  ;;  %4709 = vmatpush3.msra.mxu0 %v4287_v63 }
0x1890   :  { %v3281_v3 = vmul.f32 %v4927_v59, %v4923_v55  ;;  %4718 = vmatprep.subr.mxu0 %v5019_v23  ;;  %v4812_v59 = vpack.c.bf16 %v4293_v19, %v4292_v22  ;;  %v4352_v22 = vld [vmem:[%s5700_s14 + $0x1] ss:$0 sm:$0xff] }
0x1892   :  { %4706 = vmatmul.mubr.msk.f32.vlgmr.msra.gmra.mrb[40].mxu1 %vm229_vm2, %v3281_v3  ;;  %v4296_v3 = vld [vmem:[%s5698_s12 + $0x48] sm:$0xff] }
0x1893   :  { %4714 = vmatpush3.xpose.msk.msra.mxu1 %vm229_vm2, %v3520_v1  ;;  %4715 = vmatprep.mubr.msk.f32.mxu1 %vm5020_vm1, %v5019_v23 }
0x1894   :  { %4723 = vmatprep.subr.mxu1 %v5019_v23 }
0x1896   :  { %4716 = vmatmul.mubr.msk.f32.vlgmr.msra.gmra.mrb[42].mxu1 %vm229_vm2, %v3518_v4  ;;  %v4297_v4 = vld [vmem:[%s5698_s12 + $0x50] sm:$0xff] }
0x1897   :  { %4725 = vmatprep.mubr.msk.f32.mxu1 %vm5020_vm1, %v5019_v23 }
0x1961   :  { %v3354_v60 = vpop.f32.mrb[24].mxu0 }
0x1962   :  { %v4702_v5 = vpop.f32.mrb[25].mxu0  ;;  %4710 = vmatprep.mubr.msk.f32.mxu0 %vm229_vm2, %v3354_v60 }
0x1963   :  { %v4298_v5 = vld [vmem:[%s5698_s12 + $0x58] sm:$0xff] }
0x1965   :  { %v3430_v6 = vpop.f32.mrb[40].mxu1 }
0x1966   :  { %v4707_v7 = vpop.f32.mrb[41].mxu1  ;;  %4711 = vmatmul.mubr.msk.f32.vlgmr.msra.gmra.mrb[22].mxu0 %vm229_vm2, %v3430_v6  ;;  %v4820_v6 = vpack.c.bf16 %v4298_v5, %v4297_v4 }
0x1967   :  { %4719 = vmatpush3.xpose.msk.msra.mxu0 %vm229_vm2, %v3598_v2  ;;  %4720 = vmatprep.mubr.msk.f32.mxu0 %vm5020_vm1, %v5019_v23  ;;  %v4295_v2 = vld [vmem:[%s5698_s12 + $0x40] sm:$0xff] }
0x1968   :  { %4728 = vmatprep.subr.mxu0 %v5019_v23  ;;  %v4816_v60 = vpack.c.bf16 %v4296_v3, %v4295_v2  ;;  %v4299_v7 = vld [vmem:[%s5698_s12 + $0x60] sm:$0xff] }
0x1969   :  { %v3591_v9 = vpop.f32.mrb[42].mxu1  ;;  %v4353_v3 = vld [vmem:[%s5701_s15 + $0x1] ss:$0 sm:$0xff] }
0x196a   :  { %v3673_v10 = vmul.f32 0.35355338, %v3591_v9  ;;  %v4717_v11 = vpop.f32.mrb[43].mxu1  ;;  %4721 = vmatmul.mubr.msk.f32.vlgmr.msra.gmra.mrb[26].mxu0 %vm229_vm2, %v3596_v8  ;;  %v4300_v8 = vld [vmem:[%s5698_s12 + $0x68] sm:$0xff] }
0x196b   :  { %4730 = vmatprep.mubr.msk.f32.mxu0 %vm5020_vm1, %v5019_v23  ;;  %v4824_v9 = vpack.c.bf16 %v4300_v8, %v4299_v7 }
0x196c   :  { %v3675_v12 = vsel %vm229_vm2, %v3673_v10, -inf }
0x196d   :  { %3676 = vmax.xlane.f32.xlu0 %v3675_v12 }
0x19fa   :  { %v3677_v13 = vpop.xlane.xlu0 %3676 }
0x19fb   :  { %v3681_v14 = vsub.f32 %v3673_v10, %v3677_v13 }
0x19fd   :  { %v3683_v15 = vmul.f32 1.442695, %v3681_v14 }
0x19ff   :  { %4928 = vpow2.f32 %v3683_v15 }
0x1a09   :  { %v4929_v16 = vpop.eup %4928 }
0x1a0a   :  { %v3687_v20 = vsel %vm229_vm2, %v4929_v16, 0.0 }
0x1a0b   :  { %3688 = vadd.xlane.f32.xlu0 %v3687_v20  ;;  %v4342_v20 = vld [vmem:[%s5694_s8 + $0x1] ss:$0 sm:$0xff] }
0x1a3d   :  { %v3669_v21 = vpop.f32.mrb[26].mxu0 }
0x1a3e   :  { %v3674_v25 = vmul.f32 0.35355338, %v3669_v21  ;;  %v4722_v29 = vpop.f32.mrb[27].mxu0 }
0x1a40   :  { %v3678_v30 = vsel %vm229_vm2, %v3674_v25, -inf }
0x1a41   :  { %3679 = vmax.xlane.f32.xlu1 %v3678_v30  ;;  %v4343_v30 = vld [vmem:[%s5695_s9 + $0x1] ss:$0 sm:$0xff] }
0x1a52   :  { %3697 = vrot.lane.b32.xlu1 %v5445_v26, %s5714_s24 }
0x1a98   :  { %v3689_v23 = vpop.xlane.xlu0 %3688 }
0x1a99   :  { %4930 = vrcp.f32 %v3689_v23 }
0x1aa3   :  { %v4931_v32 = vpop.eup %4930 }
0x1aa4   :  { %v3695_v35 = vmul.f32 %v4931_v32, %v4929_v16 }
0x1ace   :  { %v3680_v31 = vpop.xlane.xlu1 %3679 }
0x1acf   :  { %v3682_v33 = vsub.f32 %v3674_v25, %v3680_v31 }
0x1ad1   :  { %v3685_v34 = vmul.f32 1.442695, %v3682_v33 }
0x1ad2   :  { %v3698_v36 = vpop.permute.xlu1 %3697 }
0x1ad3   :  { %4932 = vpow2.f32 %v3685_v34  ;;  %4724 = vmatpush3.msra.mxu1 %v3698_v36  ;;  %v4301_v34 = vld [vmem:[%s5698_s12 + $0x70] sm:$0xff] }
0x1ad4   :  { %4726 = vmatmul.mubr.msk.f32.vlgmr.msra.gmra.mrb[44].mxu1 %vm229_vm2, %v3695_v35  ;;  %v4302_v35 = vld [vmem:[%s5698_s12 + $0x78] sm:$0xff] }
0x1ad5   :  { %v4828_v36 = vpack.c.bf16 %v4302_v35, %v4301_v34 }
0x1add   :  { %v4933_v37 = vpop.eup %4932 }
0x1ade   :  { %v3690_v38 = vsel %vm229_vm2, %v4933_v37, 0.0 }
0x1adf   :  { %3691 = vadd.xlane.f32.xlu0 %v3690_v38 }
0x1af5   :  { %3773 = vrot.lane.b32.xlu0 %v5443_v24, %s5714_s24 }
0x1b6c   :  { %v3692_v26 = vpop.xlane.xlu0 %3691 }
0x1b6d   :  { %4934 = vrcp.f32 %v3692_v26 }
0x1b70   :  { %v3774_v27 = vpop.permute.xlu0 %3773 }
0x1b71   :  { %4729 = vmatpush3.msra.mxu0 %v3774_v27 }
0x1b72   :  { %4733 = vmatprep.subr.mxu0 %v4288_v39 }
0x1b77   :  { %v4935_v40 = vpop.eup %4934 }
0x1b78   :  { %v3696_v41 = vmul.f32 %v4935_v40, %v4933_v37  ;;  %v4344_v37 = vld [vmem:[%s5697_s11 + $0x1] ss:$0 sm:$0xff] }
0x1b7a   :  { %4731 = vmatmul.mubr.msk.f32.vlgmr.msra.gmra.mrb[28].mxu0 %vm229_vm2, %v3696_v41 }
0x1b7b   :  { %4734 = vmatpush3.msra.mxu0 %v4288_v39 }
0x1b7c   :  { %4817 = vmatprep.subr.bf16.mxu0 %v4816_v60 }
0x1ba7   :  { %v3769_v42 = vpop.f32.mrb[44].mxu1 }
0x1ba8   :  { %v4727_v43 = vpop.f32.mrb[45].mxu1  ;;  %4735 = vmatprep.mubr.msk.f32.mxu0 %vm229_vm2, %v3769_v42  ;;  %v4347_v42 = vld [vmem:[%s5699_s13 + $0x1] ss:$0 sm:$0xff] }
0x1c4d   :  { %v3845_v44 = vpop.f32.mrb[28].mxu0 }
0x1c4e   :  { %v4732_v24 = vpop.f32.mrb[29].mxu0  ;;  %4736 = vmatmul.mubr.msk.f32.vlgmr.msra.gmra.mrb[22].mxu0 %vm229_vm2, %v3845_v44 }
0x1c4f   :  { %4819 = vmatpush3.bf16.msra.mxu0 %v4816_v60 }
0x1c50   :  { %4821 = vmatprep.subr.bf16.mxu0 %v4820_v6 }
0x1c53   :  { %4823 = vmatpush3.bf16.msra.mxu0 %v4820_v6 }
0x1c54   :  { %4825 = vmatprep.subr.bf16.mxu0 %v4824_v9 }
0x1c57   :  { %4827 = vmatpush3.bf16.msra.mxu0 %v4824_v9 }
0x1c58   :  { %4829 = vmatprep.subr.bf16.mxu0 %v4828_v36 }
0x1c5b   :  { %4831 = vmatpush3.bf16.msra.mxu0 %v4828_v36 }
0x1d21   :  { %v4737_v46 = vpop.f32.mrb[22].mxu0 }
0x1d22   :  { %v3939_v28 = vadd.f32 %v4737_v46, %v4339_v45  ;;  %v3921_v47 = vpop.f32.mrb[23].mxu0 }
0x1d23   :  { %v3938_v48 = vadd.f32 %v4339_v45, %v3921_v47 }
0x1d24   :  { %v3941_v49 = vadd.f32 %v3939_v28, %v5432_v18 }
0x1d25   :  { %v3940_v50 = vadd.f32 %v3938_v48, %v5430_v17  ;;  %v4290_v17 = vld [vmem:[%s5696_s10 + $0x20] sm:$0xff] }
0x1d26   :  { %v3949_v51 = vsel %vm144_vm0, %v3941_v49, 0.0  ;;  %v4808_v1 = vpack.c.bf16 %v4291_v0, %v4290_v17 }
0x1d27   :  { %3950 = vadd.xlane.f32.xlu0 %v3949_v51  ;;  %v3946_v52 = vsel %vm144_vm0, %v3940_v50, 0.0 }
0x1d28   :  { %3947 = vadd.xlane.f32.xlu1 %v3946_v52  ;;  %4809 = vmatprep.subr.bf16.mxu1 %v4808_v1 }
0x1d29   :  { %4811 = vmatpush3.bf16.msra.mxu1 %v4808_v1 }
0x1d2a   :  { %4813 = vmatprep.subr.bf16.mxu1 %v4812_v59 }
0x1d2d   :  { %4815 = vmatpush3.bf16.msra.mxu1 %v4812_v59 }
0x1db4   :  { %v3951_v53 = vpop.xlane.xlu0 %3950 }
0x1db5   :  { %v3953_v54 = vmul.f32 0.03125, %v3951_v53  ;;  %v3948_v55 = vpop.xlane.xlu1 %3947 }
0x1db6   :  { %v3952_v56 = vmul.f32 0.03125, %v3948_v55 }
0x1db7   :  { %v3955_v57 = vsub.f32 %v3941_v49, %v3953_v54 }
0x1db8   :  { %v3954_v58 = vsub.f32 %v3940_v50, %v3952_v56 }
0x1db9   :  { %v3957_v61 = vmul.f32 %v3955_v57, %v3955_v57 }
0x1dba   :  { %v3956_v62 = vmul.f32 %v3954_v58, %v3954_v58 }
0x1dbb   :  { %v3961_v63 = vsel %vm144_vm0, %v3957_v61, 0.0 }
0x1dbc   :  { %3962 = vadd.xlane.f32.xlu0 %v3961_v63  ;;  %v3958_v18 = vsel %vm144_vm0, %v3956_v62, 0.0 }
0x1dbd   :  { %3959 = vadd.xlane.f32.xlu1 %v3958_v18 }
0x1e49   :  { %v3963_v10 = vpop.xlane.xlu0 %3962 }
0x1e4a   :  { %v3965_v11 = vmul.f32 0.03125, %v3963_v10  ;;  %v3960_v12 = vpop.xlane.xlu1 %3959 }
0x1e4b   :  { %v3964_v13 = vmul.f32 0.03125, %v3960_v12 }
0x1e4c   :  { %v3967_v14 = vadd.f32 1e-05, %v3965_v11 }
0x1e4d   :  { %v3966_v15 = vadd.f32 1e-05, %v3964_v13 }
0x1e4e   :  { %4936 = vrsqrt.f32 %v3967_v14 }
0x1e4f   :  { %4938 = vrsqrt.f32 %v3966_v15 }
0x1e58   :  { %v4937_v16 = vpop.eup %4936 }
0x1e59   :  { %v4939_v21 = vpop.eup %4938  ;;  %v3971_v25 = vmul.f32 %v4937_v16, %v3955_v57 }
0x1e5a   :  { %v3970_v29 = vmul.f32 %v4939_v21, %v3954_v58 }
0x1e5b   :  { %v3979_v23 = vmul.f32 %v4342_v20, %v3971_v25 }
0x1e5c   :  { %v3978_v31 = vmul.f32 %v4342_v20, %v3970_v29 }
0x1e5d   :  { %v3987_v33 = vadd.f32 %v4343_v30, %v3979_v23 }
0x1e5e   :  { %v3986_v32 = vadd.f32 %v4343_v30, %v3978_v31 }
0x1e60   :  { %4746 = vmatprep.mubr.msk.f32.mxu1 %vm144_vm0, %v3986_v32 }
0x1e61   :  { %4747 = vmatmul.mubr.msk.f32.vlgmr.msra.gmra.mrb[46].mxu1 %vm144_vm0, %v3987_v33 }
0x1f34   :  { %v4748_v38 = vpop.f32.mrb[46].mxu1 }
0x1f35   :  { %v4072_v26 = vadd.f32 %v4748_v38, %v4344_v37  ;;  %v4066_v39 = vpop.f32.mrb[47].mxu1 }
0x1f36   :  { %v4067_v27 = vadd.f32 %v4344_v37, %v4066_v39 }
0x1f37   :  { %v4076_v41 = vmax.f32 %v4072_v26, 0.0 }
0x1f38   :  { %v4075_v40 = vmax.f32 %v4067_v27, 0.0 }
0x1f3a   :  { %4765 = vmatprep.mubr.msk.f32.mxu0 %vm2031_vm3, %v4075_v40 }
0x1f3b   :  { %4766 = vmatmul.mubr.msk.f32.vlgmr.msra.gmra.mrb[30].mxu0 %vm2031_vm3, %v4076_v41 }
0x200e   :  { %v4767_v43 = vpop.f32.mrb[30].mxu0 }
0x200f   :  { %v4161_v44 = vadd.f32 %v4767_v43, %v4347_v42  ;;  %v4155_v24 = vpop.f32.mrb[31].mxu0 }
0x2010   :  { %v4156_v45 = vadd.f32 %v4347_v42, %v4155_v24 }
0x2011   :  { %v4165_v46 = vadd.f32 %v4161_v44, %v3987_v33 }
0x2012   :  { %v4164_v28 = vadd.f32 %v4156_v45, %v3986_v32 }
0x2013   :  { %v4173_v47 = vsel %vm144_vm0, %v4165_v46, 0.0 }
0x2014   :  { %4174 = vadd.xlane.f32.xlu0 %v4173_v47  ;;  %v4170_v48 = vsel %vm144_vm0, %v4164_v28, 0.0 }
0x2015   :  { %4171 = vadd.xlane.f32.xlu1 %v4170_v48 }
0x20a1   :  { %v4175_v49 = vpop.xlane.xlu0 %4174 }
0x20a2   :  { %v4177_v50 = vmul.f32 0.03125, %v4175_v49  ;;  %v4172_v51 = vpop.xlane.xlu1 %4171 }
0x20a3   :  { %v4176_v52 = vmul.f32 0.03125, %v4172_v51 }
0x20a4   :  { %v4179_v53 = vsub.f32 %v4165_v46, %v4177_v50 }
0x20a5   :  { %v4178_v54 = vsub.f32 %v4164_v28, %v4176_v52 }
0x20a6   :  { %v4181_v55 = vmul.f32 %v4179_v53, %v4179_v53 }
0x20a7   :  { %v4180_v56 = vmul.f32 %v4178_v54, %v4178_v54 }
0x20a8   :  { %v4185_v57 = vsel %vm144_vm0, %v4181_v55, 0.0 }
0x20a9   :  { %4186 = vadd.xlane.f32.xlu0 %v4185_v57  ;;  %v4182_v58 = vsel %vm144_vm0, %v4180_v56, 0.0 }
0x20aa   :  { %4183 = vadd.xlane.f32.xlu1 %v4182_v58 }
0x2136   :  { %v4187_v61 = vpop.xlane.xlu0 %4186 }
0x2137   :  { %v4189_v62 = vmul.f32 0.03125, %v4187_v61  ;;  %v4184_v63 = vpop.xlane.xlu1 %4183 }
0x2138   :  { %v4188_v18 = vmul.f32 0.03125, %v4184_v63 }
0x2139   :  { %v4191_v17 = vadd.f32 1e-05, %v4189_v62 }
0x213a   :  { %v4190_v0 = vadd.f32 1e-05, %v4188_v18 }
0x213b   :  { %4940 = vrsqrt.f32 %v4191_v17 }
0x213c   :  { %4942 = vrsqrt.f32 %v4190_v0 }
0x2145   :  { %v4941_v1 = vpop.eup %4940 }
0x2146   :  { %v4943_v19 = vpop.eup %4942  ;;  %v4195_v59 = vmul.f32 %v4941_v1, %v4179_v53 }
0x2147   :  { %v4194_v2 = vmul.f32 %v4943_v19, %v4178_v54 }
0x2148   :  { %v4203_v4 = vmul.f32 %v4352_v22, %v4195_v59 }
0x2149   :  { %v4202_v60 = vmul.f32 %v4352_v22, %v4194_v2 }
0x214a   :  { %v4211_v5 = vadd.f32 %v4353_v3, %v4203_v4 }
0x214b   :  { %v4210_v6 = vadd.f32 %v4353_v3, %v4202_v60 }
0x214c   :  { %4213 = vst.msk [vmem:[#allocation7 + $0x8] sm:$0xff] %vm144_vm0, %v4211_v5 }
0x214d   :  { %4212 = vst.msk [vmem:[#allocation7] sm:$0xff] %vm144_vm0, %v4210_v6 }
0x214e   :  { %4999 = shalt.err (!%p4996_p6)
}
0x214f   :  { %s5000_s19 = scalar_lea.hbm %s5702_s16, 256 }
0x2150   :  { %p5001_p7 = scmp.ne.s32.totalorder %s5702_s16, %s5000_s19  ;;  %p5004_p8 = scmp.lt.u32.totalorder %s5000_s19, %s5702_s16 }
0x2152   :  { %p5006_p9 = pnand %p5004_p8, %p5001_p7 }
0x2154   :  { %5009 = shalt.err (!%p5006_p9)
}
0x2155   :  { %s5033_s25 = smov 128   ;;  %s5034_s3 = smov 8  }
0x2156   :  { %4225 = dma.vmem_to_hbm [thread:$0]  %s4220_s5, 256, %s5702_s16, [#allocation4], %s5033_s25, %s5033_s25, %s5034_s3  }
0x2157   :  { %5014 = dma.done.wait [#allocation4], 256  }
0x2158   :  { %5015 = vsyncadd [#allocation4], 4294967040 }
0x2159   :  { %4229 = vsyncpa [#allocation3], 1 }
0x215a   :  { %4230 = vsyncpa [#allocation6], 1 }
0x215b   :  { %4231 = vsyncpa [#allocation4], 1 }

</bundles_post_ra>
